<compile_context>
chip_gen: v5e
topology: v5e:2x2
jax: 0.10.0
libtpu: 0.0.40
codegen_flags: <defaults>
</compile_context>

<pallas_src>
import math
import functools

import jax
import jax.numpy as jnp
from jax.experimental import pallas as pl
from jax.experimental.pallas import tpu as pltpu


# ---------------------------------------------------------------------------
# helpers
# ---------------------------------------------------------------------------
def _fast_recip(x):
    """EUP approximate reciprocal + 2 Newton steps on a tiny (Tq, 1) operand.
    Avoids the full-width divide; accuracy ~f32 for the strict-f32 check."""
    r = pl.reciprocal(x, approx=True)
    r = r * (2.0 - x * r)
    r = r * (2.0 - x * r)
    return r


# ---------------------------------------------------------------------------
# Pallas kernel: one (batch, head-group, query-tile) step of the AKT
# "distance-aware" attention.  All blocks are lane-dense (feature axis = heads*d_k).
# ---------------------------------------------------------------------------
def _akt_attn_kernel(gamma_ref, q_ref, k_ref, v_ref, mask_ref, o_ref, *,
                     heads_per_block: int, d_k: int, q_tile: int, k_tile: int,
                     seq_len: int, zero_pad: bool, matmul_dtype):
    hg = pl.program_id(1)          # head-group index
    qi = pl.program_id(2)          # query-tile index

    # ---- per-step (head-shared) quantities, hoisted out of the head loop ----
    mask = mask_ref[0, 0]                       # (Tq, S) f32, 1 = keep / 0 = masked
    mask_zero = (mask == 0.0)

    row_l = jax.lax.broadcasted_iota(jnp.int32, (q_tile, seq_len), 0)
    col = jax.lax.broadcasted_iota(jnp.int32, (q_tile, seq_len), 1)
    row_g = row_l + qi * q_tile                                   # global query idx
    position_effect = jnp.abs(col - row_g).astype(jnp.float32)    # |x1 - x2|

    # small (Tk, Tk) upper-triangular (incl. diag) matrix for the block-wise cumsum
    a_i = jax.lax.broadcasted_iota(jnp.int32, (k_tile, k_tile), 0)
    b_i = jax.lax.broadcasted_iota(jnp.int32, (k_tile, k_tile), 1)
    tri = (a_i <= b_i).astype(matmul_dtype)                       # (Tk, Tk)

    scale = jnp.float32(1.0 / math.sqrt(d_k))
    neg_big = jnp.float32(-1e32)
    n_chunks = seq_len // k_tile

    if zero_pad:
        zero_row = (row_g == 0)

    outs = []
    for h in range(heads_per_block):             # static unroll (Hb is small)
        lo = h * d_k
        q_h = q_ref[0, :, lo:lo + d_k].astype(matmul_dtype)       # (Tq, dk)
        k_h = k_ref[0, :, lo:lo + d_k].astype(matmul_dtype)       # (S, dk)
        v_h = v_ref[0, :, lo:lo + d_k].astype(matmul_dtype)       # (S, dk)
        # per-head gamma, already = -softplus(gammas[h]) (scalar from SMEM)
        gamma = gamma_ref[hg * heads_per_block + h]

        # QK^T via dot_general contracting the last dims (no explicit k.T)
        scores = jax.lax.dot_general(
            q_h, k_h, dimension_numbers=(((1,), (1,)), ((), ())),
            preferred_element_type=jnp.float32) * scale           # (Tq, S) f32

        # ---- no-grad block of the reference: masked softmax + distance stats ----
        masked_scores = jnp.where(mask_zero, neg_big, scores)
        m1 = jnp.max(masked_scores, axis=-1, keepdims=True)
        e1 = jnp.exp(masked_scores - m1)
        inv1 = _fast_recip(jnp.sum(e1, axis=-1, keepdims=True))
        scores_ = (e1 * inv1) * mask                              # (Tq, S)

        # block-wise inclusive cumsum along the key axis: per chunk a small
        # (Tq,Tk)x(Tk,Tk) matmul plus a carried row prefix.
        sc_md = scores_.astype(matmul_dtype)
        prefix = None
        cum_chunks = []
        for c in range(n_chunks):
            chunk = sc_md[:, c * k_tile:(c + 1) * k_tile]
            cum = jnp.dot(chunk, tri, preferred_element_type=jnp.float32)
            if prefix is not None:
                cum = cum + prefix
            cum_chunks.append(cum)
            prefix = cum[:, k_tile - 1:k_tile]
        distcum_scores = (cum_chunks[0] if n_chunks == 1
                          else jnp.concatenate(cum_chunks, axis=-1))
        disttotal_scores = prefix                  # last lane of the cumsum == row sum

        dist_scores = jnp.sqrt(jnp.maximum(
            (disttotal_scores - distcum_scores) * position_effect, 0.0))
        total_effect = jnp.clip(jnp.exp(dist_scores * gamma),
                                jnp.float32(1e-5), jnp.float32(1e5))

        scores2 = scores * total_effect
        # NOTE: reference's `scores.masked_fill(mask == 0, -1e23)` is a discarded
        # no-op, so no masking is applied here (reproduced exactly).
        m2 = jnp.max(scores2, axis=-1, keepdims=True)
        e2 = jnp.exp(scores2 - m2)
        attn = e2 * _fast_recip(jnp.sum(e2, axis=-1, keepdims=True))

        if zero_pad:
            attn = jnp.where(zero_row, jnp.float32(0.0), attn)

        # dropout == identity (deterministic forward)
        out_h = jnp.dot(attn.astype(matmul_dtype), v_h,
                        preferred_element_type=jnp.float32)       # (Tq, dk)
        outs.append(out_h)

    # single lane-dense store of the whole (Tq, Hb*dk) head-group output
    out_all = outs[0] if heads_per_block == 1 else jnp.concatenate(outs, axis=-1)
    o_ref[0] = out_all.astype(o_ref.dtype)


# ---------------------------------------------------------------------------
# Tiling / VMEM-budget choosers.
# ---------------------------------------------------------------------------
def _vmem_capacity_bytes():
    try:
        cap = int(pltpu.get_tpu_info().vmem_capacity_bytes)
        if cap > 0:
            return cap
    except Exception:
        pass
    return 64 * 2**20            # conservative default (v7x per-core VMEM)


def _choose_q_tile(seq_len: int, max_tile: int) -> int:
    if seq_len <= max_tile:
        return seq_len           # full extent is always BlockSpec-legal
    for t in range(max_tile, 15, -1):
        if seq_len % t == 0 and t % 16 == 0:
            return t
    for t in range(max_tile, 7, -1):
        if seq_len % t == 0 and t % 8 == 0:
            return t
    return seq_len               # fallback: no tiling (still correct)


def _choose_k_tile(seq_len: int) -> int:
    if seq_len <= 256:
        return seq_len
    for t in (128, 256, 192, 160, 96, 64):
        if seq_len % t == 0:
            return t
    best = 1
    for t in range(1, 257):
        if seq_len % t == 0:
            best = t
    return best if best >= 32 else seq_len


def _vmem_bytes_estimate(seq_len, q_tile, heads_per_block, d_k, in_bytes):
    f32 = 4
    hd = heads_per_block * d_k
    mask_blk = 2 * q_tile * seq_len * f32           # double-buffered mask tile
    kv_blk = 2 * 2 * seq_len * hd * in_bytes        # k and v blocks, double-buffered
    q_blk = 2 * q_tile * hd * in_bytes              # q block, double-buffered
    o_blk = 2 * q_tile * hd * f32                   # output block, double-buffered
    temps = 14 * q_tile * seq_len * f32             # live per-head intermediates
    head_out = (heads_per_block + 1) * q_tile * d_k * f32
    return mask_blk + kv_blk + q_blk + o_blk + temps + head_out


def _choose_heads_per_block(n_heads, d_k, seq_len, q_tile, in_bytes, budget_bytes):
    # A head group's lane width must be a multiple of 128 (or the full d_model)
    # so that every block stays lane-dense and BlockSpec-legal.
    cands = [c for c in range(n_heads, 0, -1)
             if n_heads % c == 0 and (c == n_heads or (c * d_k) % 128 == 0)]
    for c in cands:                                  # largest group that fits budget
        if _vmem_bytes_estimate(seq_len, q_tile, c, d_k, in_bytes) <= budget_bytes:
            return c
    return cands[-1]


def akt_attention_pallas(q, k, v, mask, gamma_neg, *, n_heads, d_k, zero_pad,
                         matmul_dtype=jnp.bfloat16, q_tile=None, k_tile=None,
                         heads_per_block=None):
    """q, k, v: (bs, S, d_model) (lane-dense, head-interleaved features);
    mask: (1, 1, S, S) (1 = keep); gamma_neg: (n_heads,) f32 = -softplus(gammas).
    Returns (bs, S, d_model) f32."""
    bs, S, d_model = q.shape
    assert n_heads * d_k == d_model

    cap = _vmem_capacity_bytes()
    max_q_tile = 512 if cap >= 96 * 2**20 else 256
    budget = cap // 4

    Tq = _choose_q_tile(S, max_q_tile) if q_tile is None else q_tile
    assert S % Tq == 0
    Tk = _choose_k_tile(S) if k_tile is None else k_tile
    assert S % Tk == 0

    in_dtype = jnp.dtype(matmul_dtype)
    q = q.astype(in_dtype)
    k = k.astype(in_dtype)
    v = v.astype(in_dtype)
    mask = mask.astype(jnp.float32)
    gamma_neg = gamma_neg.astype(jnp.float32)

    Hb = (_choose_heads_per_block(n_heads, d_k, S, Tq, in_dtype.itemsize, budget)
          if heads_per_block is None else heads_per_block)
    assert n_heads % Hb == 0
    Hd = Hb * d_k

    est = _vmem_bytes_estimate(S, Tq, Hb, d_k, in_dtype.itemsize)
    vmem_limit = int(min(int(0.75 * cap), max(32 * 2**20, int(1.5 * est))))

    # advisory cost estimate so XLA overlaps the surrounding projection matmuls
    mm_flops = 2 * bs * n_heads * S * S * (2 * d_k + Tk)
    cost = pl.CostEstimate(
        flops=int(mm_flops + 10 * bs * n_heads * S * S),
        transcendentals=int(3 * bs * n_heads * S * S),
        bytes_accessed=int(3 * bs * S * d_model * in_dtype.itemsize
                           + bs * S * d_model * 4 + S * S * 4))

    kernel = functools.partial(
        _akt_attn_kernel, heads_per_block=Hb, d_k=int(d_k), q_tile=Tq, k_tile=Tk,
        seq_len=S, zero_pad=bool(zero_pad), matmul_dtype=matmul_dtype)

    grid = (bs, n_heads // Hb, S // Tq)
    return pl.pallas_call(
        kernel,
        out_shape=jax.ShapeDtypeStruct((bs, S, d_model), jnp.float32),
        grid=grid,
        in_specs=[
            pl.BlockSpec(memory_space=pltpu.MemorySpace.SMEM),             # gamma_neg
            pl.BlockSpec((1, Tq, Hd), lambda b, hg, qi: (b, qi, hg)),      # q tile
            pl.BlockSpec((1, S, Hd), lambda b, hg, qi: (b, 0, hg)),        # k (full S)
            pl.BlockSpec((1, S, Hd), lambda b, hg, qi: (b, 0, hg)),        # v (full S)
            pl.BlockSpec((1, 1, Tq, S), lambda b, hg, qi: (0, 0, qi, 0)),  # mask tile
        ],
        out_specs=pl.BlockSpec((1, Tq, Hd), lambda b, hg, qi: (b, qi, hg)),
        compiler_params=pltpu.CompilerParams(
            dimension_semantics=("parallel", "parallel", "parallel"),
            vmem_limit_bytes=vmem_limit),
        cost_estimate=cost,
    )(gamma_neg, q, k, v, mask)


# ---------------------------------------------------------------------------
# MultiHeadAttention module (parameters + glue) built around the kernel.
# ---------------------------------------------------------------------------
def _xavier_uniform(key, shape, fan_in, fan_out, dtype=jnp.float32):
    bound = math.sqrt(6.0 / (fan_in + fan_out))
    return jax.random.uniform(key, shape, dtype, -bound, bound)


class MultiHeadAttentionPallas:
    def __init__(self, d_model, d_feature, n_heads, dropout, kq_same,
                 bias=True, key=None):
        assert d_feature * n_heads == d_model
        self.d_model = d_model
        self.d_k = d_feature
        self.h = n_heads
        self.kq_same = kq_same
        self.bias = bias
        key = jax.random.PRNGKey(0) if key is None else key
        ks = jax.random.split(key, 9)
        # Linear weights stored PyTorch-style: (out_features, in_features)
        self.k_w = _xavier_uniform(ks[0], (d_model, d_model), d_model, d_model)
        self.k_b = jnp.zeros((d_model,), jnp.float32)
        if not kq_same:
            self.q_w = _xavier_uniform(ks[1], (d_model, d_model), d_model, d_model)
            self.q_b = jnp.zeros((d_model,), jnp.float32)
        self.v_w = _xavier_uniform(ks[2], (d_model, d_model), d_model, d_model)
        self.v_b = jnp.zeros((d_model,), jnp.float32)
        self.out_w = _xavier_uniform(ks[3], (d_model, d_model), d_model, d_model)
        self.out_b = jnp.zeros((d_model,), jnp.float32)
        # gammas: (n_heads, 1, 1), xavier_uniform_ (fan_in=1, fan_out=n_heads)
        self.gammas = _xavier_uniform(ks[4], (n_heads, 1, 1), 1, n_heads)

    def _linear(self, x, w, b):
        y = jnp.dot(x, w.T)
        if self.bias:
            y = y + b
        return y

    def __call__(self, q, k, v, mask, zero_pad, matmul_dtype=jnp.bfloat16):
        k_p = self._linear(k, self.k_w, self.k_b)
        if not self.kq_same:
            q_p = self._linear(q, self.q_w, self.q_b)
        else:
            q_p = self._linear(q, self.k_w, self.k_b)
        v_p = self._linear(v, self.v_w, self.v_b)

        # no head split / transpose: the kernel consumes the lane-dense
        # (bs, S, d_model) layout directly and returns the same layout.
        # q/k/v are cast to matmul_dtype (default bf16) inside the wrapper,
        # which XLA fuses into the projection-matmul epilogue.
        gamma_neg = (-1.0 * jax.nn.softplus(self.gammas)).reshape(self.h)
        gamma_neg = gamma_neg.astype(jnp.float32)

        ctx = akt_attention_pallas(q_p, k_p, v_p, mask.astype(jnp.float32),
                                   gamma_neg, n_heads=self.h, d_k=self.d_k,
                                   zero_pad=zero_pad, matmul_dtype=matmul_dtype)
        return self._linear(ctx, self.out_w, self.out_b)


# ---------------------------------------------------------------------------
# Pure-JAX reference of the attention() function (for a numerical sanity check)
# ---------------------------------------------------------------------------
def attention_ref(q, k, v, d_k, mask, zero_pad, gammas):
    scores = jnp.einsum('bhqd,bhkd->bhqk', q, k) / math.sqrt(d_k)
    seqlen = scores.shape[2]
    x1 = jnp.arange(seqlen)[None, :]
    x2 = jnp.arange(seqlen)[:, None]
    scores_ = jnp.where(mask == 0, -1e32, scores)
    scores_ = jax.nn.softmax(scores_, axis=-1)
    scores_ = scores_ * mask.astype(jnp.float32)
    distcum = jnp.cumsum(scores_, axis=-1)
    disttotal = jnp.sum(scores_, axis=-1, keepdims=True)
    position_effect = jnp.abs(x1 - x2)[None, None].astype(jnp.float32)
    dist_scores = jnp.sqrt(jnp.clip((disttotal - distcum) * position_effect, 0.0, None))
    gamma = (-1.0 * jax.nn.softplus(gammas))[None]          # (1, h, 1, 1)
    total_effect = jnp.clip(jnp.exp(dist_scores * gamma), 1e-5, 1e5)
    scores = scores * total_effect
    scores = jax.nn.softmax(scores, axis=-1)                # no mask: reproduces no-op bug
    if zero_pad:
        scores = scores.at[:, :, 0, :].set(0.0)
    return jnp.einsum('bhqk,bhkd->bhqd', scores, v)


if __name__ == "__main__":
    # small shapes: batch=2, seq=8, d_model=32, heads=4 -> d_k=8
    bs, S, d_model, n_heads = 2, 8, 32, 4
    d_k = d_model // n_heads

    key = jax.random.PRNGKey(0)
    k_q, k_k, k_v, k_params = jax.random.split(key, 4)
    q_in = jax.random.normal(k_q, (bs, S, d_model), jnp.float32)
    k_in = jax.random.normal(k_k, (bs, S, d_model), jnp.float32)
    v_in = jax.random.normal(k_v, (bs, S, d_model), jnp.float32)

    # causal mask (lower-triangular incl. diagonal), shape (1,1,S,S) as in AKT
    mask = jnp.tril(jnp.ones((S, S), jnp.float32))[None, None]

    mha = MultiHeadAttentionPallas(d_model, d_k, n_heads, dropout=0.0,
                                   kq_same=False, bias=True, key=k_params)

    # default (bf16 MXU fast path, f32 accumulation)
    out_bf16 = mha(q_in, k_in, v_in, mask, zero_pad=True)
    out_bf16 = jax.block_until_ready(out_bf16)
    assert out_bf16.shape == (bs, S, d_model)
    assert bool(jnp.all(jnp.isfinite(out_bf16)))

    # strict f32 path for numerical validation
    out_f32 = mha(q_in, k_in, v_in, mask, zero_pad=True, matmul_dtype=jnp.float32)
    out_f32 = jax.block_until_ready(out_f32)

    # pure-JAX reference of the attention core
    def split_heads(x, w, b):
        return (jnp.dot(x, w.T) + b).reshape(bs, S, n_heads, d_k).transpose(0, 2, 1, 3)

    q_h = split_heads(q_in, mha.q_w, mha.q_b)
    k_h = split_heads(k_in, mha.k_w, mha.k_b)
    v_h = split_heads(v_in, mha.v_w, mha.v_b)
    ref_scores = attention_ref(q_h, k_h, v_h, d_k, mask, True, mha.gammas)
    ref_out = jnp.dot(ref_scores.transpose(0, 2, 1, 3).reshape(bs, S, d_model),
                      mha.out_w.T) + mha.out_b

    assert jnp.allclose(out_f32, ref_out, rtol=2e-3, atol=2e-3), \
        float(jnp.max(jnp.abs(out_f32 - ref_out)))
    # bf16 inputs / bf16 cumsum: loose tolerance against the f32 reference
    assert jnp.allclose(out_bf16, ref_out, rtol=1e-1, atol=1e-1), \
        float(jnp.max(jnp.abs(out_bf16 - ref_out)))

    print("KERNEL_OK")
</pallas_src>

<mosaic_0001>
module attributes {stable_mosaic.version = 11 : i64} {
  func.func @_akt_attn_kernel(%arg0: i32, %arg1: i32, %arg2: i32, %arg3: memref<4xf32, #tpu.memory_space<smem>>, %arg4: memref<1x8x32xbf16, #tpu.memory_space<vmem>>, %arg5: memref<1x8x32xbf16, #tpu.memory_space<vmem>>, %arg6: memref<1x8x32xbf16, #tpu.memory_space<vmem>>, %arg7: memref<1x1x8x8xf32, #tpu.memory_space<vmem>>, %arg8: memref<1x8x32xf32, #tpu.memory_space<vmem>>) attributes {dimension_semantics = [#tpu.dimension_semantics<parallel>, #tpu.dimension_semantics<parallel>, #tpu.dimension_semantics<parallel>], iteration_bounds = array<i64: 2, 1, 1>, scalar_prefetch = 0 : i64, scratch_operands = 0 : i64, tpu.core_type = #tpu.core_type<tc>, window_params = [{transform_indices = @transform_0, window_bounds = array<i64: 4>}, {transform_indices = @transform_1, window_bounds = array<i64: 1, 8, 32>}, {transform_indices = @transform_2, window_bounds = array<i64: 1, 8, 32>}, {transform_indices = @transform_3, window_bounds = array<i64: 1, 8, 32>}, {transform_indices = @transform_4, window_bounds = array<i64: 1, 1, 8, 8>}, {transform_indices = @transform_5, window_bounds = array<i64: 1, 8, 32>}]} {
    %c0 = arith.constant 0 : index
    %c0_0 = arith.constant 0 : index
    %c0_1 = arith.constant 0 : index
    %c0_2 = arith.constant 0 : index
    %0 = vector.load %arg7[%c0, %c0_0, %c0_1, %c0_2] : memref<1x1x8x8xf32, #tpu.memory_space<vmem>>, vector<1x1x8x8xf32>
    %1 = vector.shape_cast %0 : vector<1x1x8x8xf32> to vector<8x8xf32>
    %cst = arith.constant 0.000000e+00 : f32
    %2 = vector.broadcast %cst : f32 to vector<8x8xf32>
    %3 = arith.cmpf oeq, %1, %2 : vector<8x8xf32>
    %4 = tpu.iota {dimensions = array<i32: 0>} : vector<8x8xi32>
    %5 = tpu.iota {dimensions = array<i32: 1>} : vector<8x8xi32>
    %c8_i32 = arith.constant 8 : i32
    %6 = arith.muli %arg2, %c8_i32 : i32
    %7 = vector.broadcast %6 : i32 to vector<8x8xi32>
    %8 = arith.addi %4, %7 : vector<8x8xi32>
    %9 = arith.subi %5, %8 : vector<8x8xi32>
    %10 = math.absi %9 : vector<8x8xi32>
    %11 = arith.sitofp %10 : vector<8x8xi32> to vector<8x8xf32>
    %12 = tpu.iota {dimensions = array<i32: 0>} : vector<8x8xi32>
    %13 = tpu.iota {dimensions = array<i32: 1>} : vector<8x8xi32>
    %14 = arith.cmpi sle, %12, %13 : vector<8x8xi32>
    %15 = arith.extui %14 : vector<8x8xi1> to vector<8x8xi32>
    %16 = arith.sitofp %15 : vector<8x8xi32> to vector<8x8xf32>
    %17 = arith.truncf %16 : vector<8x8xf32> to vector<8x8xbf16>
    %c0_i32 = arith.constant 0 : i32
    %18 = vector.broadcast %c0_i32 : i32 to vector<8x8xi32>
    %19 = arith.cmpi eq, %8, %18 : vector<8x8xi32>
    %c0_3 = arith.constant 0 : index
    %c0_4 = arith.constant 0 : index
    %c0_5 = arith.constant 0 : index
    %20 = vector.load %arg4[%c0_3, %c0_4, %c0_5] : memref<1x8x32xbf16, #tpu.memory_space<vmem>>, vector<1x8x8xbf16>
    %21 = vector.shape_cast %20 : vector<1x8x8xbf16> to vector<8x8xbf16>
    %c0_6 = arith.constant 0 : index
    %c0_7 = arith.constant 0 : index
    %c0_8 = arith.constant 0 : index
    %22 = vector.load %arg5[%c0_6, %c0_7, %c0_8] : memref<1x8x32xbf16, #tpu.memory_space<vmem>>, vector<1x8x8xbf16>
    %23 = vector.shape_cast %22 : vector<1x8x8xbf16> to vector<8x8xbf16>
    %c0_9 = arith.constant 0 : index
    %c0_10 = arith.constant 0 : index
    %c0_11 = arith.constant 0 : index
    %24 = vector.load %arg6[%c0_9, %c0_10, %c0_11] : memref<1x8x32xbf16, #tpu.memory_space<vmem>>, vector<1x8x8xbf16>
    %25 = vector.shape_cast %24 : vector<1x8x8xbf16> to vector<8x8xbf16>
    %c4_i32 = arith.constant 4 : i32
    %26 = arith.muli %arg1, %c4_i32 : i32
    %c0_i32_12 = arith.constant 0 : i32
    %27 = arith.addi %26, %c0_i32_12 : i32
    %28 = arith.index_cast %27 : i32 to index
    %29 = memref.load %arg3[%28] : memref<4xf32, #tpu.memory_space<smem>>
    %cst_13 = arith.constant dense<0.000000e+00> : vector<8x8xf32>
    %30 = tpu.matmul %21, %23, %cst_13 {dimension_numbers = #tpu.dot_dimension_numbers<[1], [1], [0], [0], [0, 0, 1, 0], [], []>} : vector<8x8xbf16>, vector<8x8xbf16>, vector<8x8xf32> -> vector<8x8xf32>
    %cst_14 = arith.constant 0.353553385 : f32
    %31 = vector.broadcast %cst_14 : f32 to vector<8x8xf32>
    %32 = arith.mulf %30, %31 : vector<8x8xf32>
    %cst_15 = arith.constant -1.000000e+32 : f32
    %33 = vector.broadcast %cst_15 : f32 to vector<8x8xf32>
    %34 = arith.select %3, %33, %32 : vector<8x8xi1>, vector<8x8xf32>
    %cst_16 = arith.constant dense<0xFF800000> : vector<8xf32>
    %35 = vector.multi_reduction <maximumf>, %34, %cst_16 [1] : vector<8x8xf32> to vector<8xf32>
    %36 = vector.shape_cast %35 : vector<8xf32> to vector<8x1xf32>
    %37 = vector.broadcast %36 : vector<8x1xf32> to vector<8x8xf32>
    %38 = arith.subf %34, %37 : vector<8x8xf32>
    %39 = math.exp %38 : vector<8x8xf32>
    %cst_17 = arith.constant dense<0.000000e+00> : vector<8xf32>
    %40 = vector.multi_reduction <add>, %39, %cst_17 [1] : vector<8x8xf32> to vector<8xf32>
    %41 = vector.shape_cast %40 : vector<8xf32> to vector<8x1xf32>
    %42 = tpu.reciprocal %41 {approx = true} : vector<8x1xf32> -> vector<8x1xf32>
    %43 = arith.mulf %41, %42 : vector<8x1xf32>
    %cst_18 = arith.constant 2.000000e+00 : f32
    %44 = vector.broadcast %cst_18 : f32 to vector<8x1xf32>
    %45 = arith.subf %44, %43 : vector<8x1xf32>
    %46 = arith.mulf %42, %45 : vector<8x1xf32>
    %47 = arith.mulf %41, %46 : vector<8x1xf32>
    %cst_19 = arith.constant 2.000000e+00 : f32
    %48 = vector.broadcast %cst_19 : f32 to vector<8x1xf32>
    %49 = arith.subf %48, %47 : vector<8x1xf32>
    %50 = arith.mulf %46, %49 : vector<8x1xf32>
    %51 = vector.broadcast %50 : vector<8x1xf32> to vector<8x8xf32>
    %52 = arith.mulf %39, %51 : vector<8x8xf32>
    %53 = arith.mulf %52, %1 : vector<8x8xf32>
    %54 = arith.truncf %53 : vector<8x8xf32> to vector<8x8xbf16>
    %cst_20 = arith.constant dense<0.000000e+00> : vector<8x8xf32>
    %55 = tpu.matmul %54, %17, %cst_20 {dimension_numbers = #tpu.dot_dimension_numbers<[1], [0], [0], [1], [0, 0, 1, 1], [], []>} : vector<8x8xbf16>, vector<8x8xbf16>, vector<8x8xf32> -> vector<8x8xf32>
    %56 = vector.extract_strided_slice %55 {offsets = [0, 7], sizes = [8, 1], strides = [1, 1]} : vector<8x8xf32> to vector<8x1xf32>
    %57 = vector.broadcast %56 : vector<8x1xf32> to vector<8x8xf32>
    %58 = arith.subf %57, %55 : vector<8x8xf32>
    %59 = arith.mulf %58, %11 : vector<8x8xf32>
    %cst_21 = arith.constant 0.000000e+00 : f32
    %60 = vector.broadcast %cst_21 : f32 to vector<8x8xf32>
    %61 = arith.maximumf %59, %60 : vector<8x8xf32>
    %62 = math.sqrt %61 : vector<8x8xf32>
    %63 = vector.broadcast %29 : f32 to vector<8x8xf32>
    %64 = arith.mulf %62, %63 : vector<8x8xf32>
    %65 = math.exp %64 : vector<8x8xf32>
    %cst_22 = arith.constant 9.99999974E-6 : f32
    %cst_23 = arith.constant 1.000000e+05 : f32
    %66 = vector.broadcast %cst_22 : f32 to vector<8x8xf32>
    %67 = arith.maximumf %66, %65 : vector<8x8xf32>
    %68 = vector.broadcast %cst_23 : f32 to vector<8x8xf32>
    %69 = arith.minimumf %68, %67 : vector<8x8xf32>
    %70 = arith.mulf %32, %69 : vector<8x8xf32>
    %cst_24 = arith.constant dense<0xFF800000> : vector<8xf32>
    %71 = vector.multi_reduction <maximumf>, %70, %cst_24 [1] : vector<8x8xf32> to vector<8xf32>
    %72 = vector.shape_cast %71 : vector<8xf32> to vector<8x1xf32>
    %73 = vector.broadcast %72 : vector<8x1xf32> to vector<8x8xf32>
    %74 = arith.subf %70, %73 : vector<8x8xf32>
    %75 = math.exp %74 : vector<8x8xf32>
    %cst_25 = arith.constant dense<0.000000e+00> : vector<8xf32>
    %76 = vector.multi_reduction <add>, %75, %cst_25 [1] : vector<8x8xf32> to vector<8xf32>
    %77 = vector.shape_cast %76 : vector<8xf32> to vector<8x1xf32>
    %78 = tpu.reciprocal %77 {approx = true} : vector<8x1xf32> -> vector<8x1xf32>
    %79 = arith.mulf %77, %78 : vector<8x1xf32>
    %cst_26 = arith.constant 2.000000e+00 : f32
    %80 = vector.broadcast %cst_26 : f32 to vector<8x1xf32>
    %81 = arith.subf %80, %79 : vector<8x1xf32>
    %82 = arith.mulf %78, %81 : vector<8x1xf32>
    %83 = arith.mulf %77, %82 : vector<8x1xf32>
    %cst_27 = arith.constant 2.000000e+00 : f32
    %84 = vector.broadcast %cst_27 : f32 to vector<8x1xf32>
    %85 = arith.subf %84, %83 : vector<8x1xf32>
    %86 = arith.mulf %82, %85 : vector<8x1xf32>
    %87 = vector.broadcast %86 : vector<8x1xf32> to vector<8x8xf32>
    %88 = arith.mulf %75, %87 : vector<8x8xf32>
    %cst_28 = arith.constant 0.000000e+00 : f32
    %89 = vector.broadcast %cst_28 : f32 to vector<8x8xf32>
    %90 = arith.select %19, %89, %88 : vector<8x8xi1>, vector<8x8xf32>
    %91 = arith.truncf %90 : vector<8x8xf32> to vector<8x8xbf16>
    %cst_29 = arith.constant dense<0.000000e+00> : vector<8x8xf32>
    %92 = tpu.matmul %91, %25, %cst_29 {dimension_numbers = #tpu.dot_dimension_numbers<[1], [0], [0], [1], [0, 0, 1, 1], [], []>} : vector<8x8xbf16>, vector<8x8xbf16>, vector<8x8xf32> -> vector<8x8xf32>
    %c0_30 = arith.constant 0 : index
    %c0_31 = arith.constant 0 : index
    %c8 = arith.constant 8 : index
    %93 = vector.load %arg4[%c0_30, %c0_31, %c8] : memref<1x8x32xbf16, #tpu.memory_space<vmem>>, vector<1x8x8xbf16>
    %94 = vector.shape_cast %93 : vector<1x8x8xbf16> to vector<8x8xbf16>
    %c0_32 = arith.constant 0 : index
    %c0_33 = arith.constant 0 : index
    %c8_34 = arith.constant 8 : index
    %95 = vector.load %arg5[%c0_32, %c0_33, %c8_34] : memref<1x8x32xbf16, #tpu.memory_space<vmem>>, vector<1x8x8xbf16>
    %96 = vector.shape_cast %95 : vector<1x8x8xbf16> to vector<8x8xbf16>
    %c0_35 = arith.constant 0 : index
    %c0_36 = arith.constant 0 : index
    %c8_37 = arith.constant 8 : index
    %97 = vector.load %arg6[%c0_35, %c0_36, %c8_37] : memref<1x8x32xbf16, #tpu.memory_space<vmem>>, vector<1x8x8xbf16>
    %98 = vector.shape_cast %97 : vector<1x8x8xbf16> to vector<8x8xbf16>
    %c4_i32_38 = arith.constant 4 : i32
    %99 = arith.muli %arg1, %c4_i32_38 : i32
    %c1_i32 = arith.constant 1 : i32
    %100 = arith.addi %99, %c1_i32 : i32
    %101 = arith.index_cast %100 : i32 to index
    %102 = memref.load %arg3[%101] : memref<4xf32, #tpu.memory_space<smem>>
    %cst_39 = arith.constant dense<0.000000e+00> : vector<8x8xf32>
    %103 = tpu.matmul %94, %96, %cst_39 {dimension_numbers = #tpu.dot_dimension_numbers<[1], [1], [0], [0], [0, 0, 1, 0], [], []>} : vector<8x8xbf16>, vector<8x8xbf16>, vector<8x8xf32> -> vector<8x8xf32>
    %cst_40 = arith.constant 0.353553385 : f32
    %104 = vector.broadcast %cst_40 : f32 to vector<8x8xf32>
    %105 = arith.mulf %103, %104 : vector<8x8xf32>
    %cst_41 = arith.constant -1.000000e+32 : f32
    %106 = vector.broadcast %cst_41 : f32 to vector<8x8xf32>
    %107 = arith.select %3, %106, %105 : vector<8x8xi1>, vector<8x8xf32>
    %cst_42 = arith.constant dense<0xFF800000> : vector<8xf32>
    %108 = vector.multi_reduction <maximumf>, %107, %cst_42 [1] : vector<8x8xf32> to vector<8xf32>
    %109 = vector.shape_cast %108 : vector<8xf32> to vector<8x1xf32>
    %110 = vector.broadcast %109 : vector<8x1xf32> to vector<8x8xf32>
    %111 = arith.subf %107, %110 : vector<8x8xf32>
    %112 = math.exp %111 : vector<8x8xf32>
    %cst_43 = arith.constant dense<0.000000e+00> : vector<8xf32>
    %113 = vector.multi_reduction <add>, %112, %cst_43 [1] : vector<8x8xf32> to vector<8xf32>
    %114 = vector.shape_cast %113 : vector<8xf32> to vector<8x1xf32>
    %115 = tpu.reciprocal %114 {approx = true} : vector<8x1xf32> -> vector<8x1xf32>
    %116 = arith.mulf %114, %115 : vector<8x1xf32>
    %cst_44 = arith.constant 2.000000e+00 : f32
    %117 = vector.broadcast %cst_44 : f32 to vector<8x1xf32>
    %118 = arith.subf %117, %116 : vector<8x1xf32>
    %119 = arith.mulf %115, %118 : vector<8x1xf32>
    %120 = arith.mulf %114, %119 : vector<8x1xf32>
    %cst_45 = arith.constant 2.000000e+00 : f32
    %121 = vector.broadcast %cst_45 : f32 to vector<8x1xf32>
    %122 = arith.subf %121, %120 : vector<8x1xf32>
    %123 = arith.mulf %119, %122 : vector<8x1xf32>
    %124 = vector.broadcast %123 : vector<8x1xf32> to vector<8x8xf32>
    %125 = arith.mulf %112, %124 : vector<8x8xf32>
    %126 = arith.mulf %125, %1 : vector<8x8xf32>
    %127 = arith.truncf %126 : vector<8x8xf32> to vector<8x8xbf16>
    %cst_46 = arith.constant dense<0.000000e+00> : vector<8x8xf32>
    %128 = tpu.matmul %127, %17, %cst_46 {dimension_numbers = #tpu.dot_dimension_numbers<[1], [0], [0], [1], [0, 0, 1, 1], [], []>} : vector<8x8xbf16>, vector<8x8xbf16>, vector<8x8xf32> -> vector<8x8xf32>
    %129 = vector.extract_strided_slice %128 {offsets = [0, 7], sizes = [8, 1], strides = [1, 1]} : vector<8x8xf32> to vector<8x1xf32>
    %130 = vector.broadcast %129 : vector<8x1xf32> to vector<8x8xf32>
    %131 = arith.subf %130, %128 : vector<8x8xf32>
    %132 = arith.mulf %131, %11 : vector<8x8xf32>
    %cst_47 = arith.constant 0.000000e+00 : f32
    %133 = vector.broadcast %cst_47 : f32 to vector<8x8xf32>
    %134 = arith.maximumf %132, %133 : vector<8x8xf32>
    %135 = math.sqrt %134 : vector<8x8xf32>
    %136 = vector.broadcast %102 : f32 to vector<8x8xf32>
    %137 = arith.mulf %135, %136 : vector<8x8xf32>
    %138 = math.exp %137 : vector<8x8xf32>
    %cst_48 = arith.constant 9.99999974E-6 : f32
    %cst_49 = arith.constant 1.000000e+05 : f32
    %139 = vector.broadcast %cst_48 : f32 to vector<8x8xf32>
    %140 = arith.maximumf %139, %138 : vector<8x8xf32>
    %141 = vector.broadcast %cst_49 : f32 to vector<8x8xf32>
    %142 = arith.minimumf %141, %140 : vector<8x8xf32>
    %143 = arith.mulf %105, %142 : vector<8x8xf32>
    %cst_50 = arith.constant dense<0xFF800000> : vector<8xf32>
    %144 = vector.multi_reduction <maximumf>, %143, %cst_50 [1] : vector<8x8xf32> to vector<8xf32>
    %145 = vector.shape_cast %144 : vector<8xf32> to vector<8x1xf32>
    %146 = vector.broadcast %145 : vector<8x1xf32> to vector<8x8xf32>
    %147 = arith.subf %143, %146 : vector<8x8xf32>
    %148 = math.exp %147 : vector<8x8xf32>
    %cst_51 = arith.constant dense<0.000000e+00> : vector<8xf32>
    %149 = vector.multi_reduction <add>, %148, %cst_51 [1] : vector<8x8xf32> to vector<8xf32>
    %150 = vector.shape_cast %149 : vector<8xf32> to vector<8x1xf32>
    %151 = tpu.reciprocal %150 {approx = true} : vector<8x1xf32> -> vector<8x1xf32>
    %152 = arith.mulf %150, %151 : vector<8x1xf32>
    %cst_52 = arith.constant 2.000000e+00 : f32
    %153 = vector.broadcast %cst_52 : f32 to vector<8x1xf32>
    %154 = arith.subf %153, %152 : vector<8x1xf32>
    %155 = arith.mulf %151, %154 : vector<8x1xf32>
    %156 = arith.mulf %150, %155 : vector<8x1xf32>
    %cst_53 = arith.constant 2.000000e+00 : f32
    %157 = vector.broadcast %cst_53 : f32 to vector<8x1xf32>
    %158 = arith.subf %157, %156 : vector<8x1xf32>
    %159 = arith.mulf %155, %158 : vector<8x1xf32>
    %160 = vector.broadcast %159 : vector<8x1xf32> to vector<8x8xf32>
    %161 = arith.mulf %148, %160 : vector<8x8xf32>
    %cst_54 = arith.constant 0.000000e+00 : f32
    %162 = vector.broadcast %cst_54 : f32 to vector<8x8xf32>
    %163 = arith.select %19, %162, %161 : vector<8x8xi1>, vector<8x8xf32>
    %164 = arith.truncf %163 : vector<8x8xf32> to vector<8x8xbf16>
    %cst_55 = arith.constant dense<0.000000e+00> : vector<8x8xf32>
    %165 = tpu.matmul %164, %98, %cst_55 {dimension_numbers = #tpu.dot_dimension_numbers<[1], [0], [0], [1], [0, 0, 1, 1], [], []>} : vector<8x8xbf16>, vector<8x8xbf16>, vector<8x8xf32> -> vector<8x8xf32>
    %c0_56 = arith.constant 0 : index
    %c0_57 = arith.constant 0 : index
    %c16 = arith.constant 16 : index
    %166 = vector.load %arg4[%c0_56, %c0_57, %c16] : memref<1x8x32xbf16, #tpu.memory_space<vmem>>, vector<1x8x8xbf16>
    %167 = vector.shape_cast %166 : vector<1x8x8xbf16> to vector<8x8xbf16>
    %c0_58 = arith.constant 0 : index
    %c0_59 = arith.constant 0 : index
    %c16_60 = arith.constant 16 : index
    %168 = vector.load %arg5[%c0_58, %c0_59, %c16_60] : memref<1x8x32xbf16, #tpu.memory_space<vmem>>, vector<1x8x8xbf16>
    %169 = vector.shape_cast %168 : vector<1x8x8xbf16> to vector<8x8xbf16>
    %c0_61 = arith.constant 0 : index
    %c0_62 = arith.constant 0 : index
    %c16_63 = arith.constant 16 : index
    %170 = vector.load %arg6[%c0_61, %c0_62, %c16_63] : memref<1x8x32xbf16, #tpu.memory_space<vmem>>, vector<1x8x8xbf16>
    %171 = vector.shape_cast %170 : vector<1x8x8xbf16> to vector<8x8xbf16>
    %c4_i32_64 = arith.constant 4 : i32
    %172 = arith.muli %arg1, %c4_i32_64 : i32
    %c2_i32 = arith.constant 2 : i32
    %173 = arith.addi %172, %c2_i32 : i32
    %174 = arith.index_cast %173 : i32 to index
    %175 = memref.load %arg3[%174] : memref<4xf32, #tpu.memory_space<smem>>
    %cst_65 = arith.constant dense<0.000000e+00> : vector<8x8xf32>
    %176 = tpu.matmul %167, %169, %cst_65 {dimension_numbers = #tpu.dot_dimension_numbers<[1], [1], [0], [0], [0, 0, 1, 0], [], []>} : vector<8x8xbf16>, vector<8x8xbf16>, vector<8x8xf32> -> vector<8x8xf32>
    %cst_66 = arith.constant 0.353553385 : f32
    %177 = vector.broadcast %cst_66 : f32 to vector<8x8xf32>
    %178 = arith.mulf %176, %177 : vector<8x8xf32>
    %cst_67 = arith.constant -1.000000e+32 : f32
    %179 = vector.broadcast %cst_67 : f32 to vector<8x8xf32>
    %180 = arith.select %3, %179, %178 : vector<8x8xi1>, vector<8x8xf32>
    %cst_68 = arith.constant dense<0xFF800000> : vector<8xf32>
    %181 = vector.multi_reduction <maximumf>, %180, %cst_68 [1] : vector<8x8xf32> to vector<8xf32>
    %182 = vector.shape_cast %181 : vector<8xf32> to vector<8x1xf32>
    %183 = vector.broadcast %182 : vector<8x1xf32> to vector<8x8xf32>
    %184 = arith.subf %180, %183 : vector<8x8xf32>
    %185 = math.exp %184 : vector<8x8xf32>
    %cst_69 = arith.constant dense<0.000000e+00> : vector<8xf32>
    %186 = vector.multi_reduction <add>, %185, %cst_69 [1] : vector<8x8xf32> to vector<8xf32>
    %187 = vector.shape_cast %186 : vector<8xf32> to vector<8x1xf32>
    %188 = tpu.reciprocal %187 {approx = true} : vector<8x1xf32> -> vector<8x1xf32>
    %189 = arith.mulf %187, %188 : vector<8x1xf32>
    %cst_70 = arith.constant 2.000000e+00 : f32
    %190 = vector.broadcast %cst_70 : f32 to vector<8x1xf32>
    %191 = arith.subf %190, %189 : vector<8x1xf32>
    %192 = arith.mulf %188, %191 : vector<8x1xf32>
    %193 = arith.mulf %187, %192 : vector<8x1xf32>
    %cst_71 = arith.constant 2.000000e+00 : f32
    %194 = vector.broadcast %cst_71 : f32 to vector<8x1xf32>
    %195 = arith.subf %194, %193 : vector<8x1xf32>
    %196 = arith.mulf %192, %195 : vector<8x1xf32>
    %197 = vector.broadcast %196 : vector<8x1xf32> to vector<8x8xf32>
    %198 = arith.mulf %185, %197 : vector<8x8xf32>
    %199 = arith.mulf %198, %1 : vector<8x8xf32>
    %200 = arith.truncf %199 : vector<8x8xf32> to vector<8x8xbf16>
    %cst_72 = arith.constant dense<0.000000e+00> : vector<8x8xf32>
    %201 = tpu.matmul %200, %17, %cst_72 {dimension_numbers = #tpu.dot_dimension_numbers<[1], [0], [0], [1], [0, 0, 1, 1], [], []>} : vector<8x8xbf16>, vector<8x8xbf16>, vector<8x8xf32> -> vector<8x8xf32>
    %202 = vector.extract_strided_slice %201 {offsets = [0, 7], sizes = [8, 1], strides = [1, 1]} : vector<8x8xf32> to vector<8x1xf32>
    %203 = vector.broadcast %202 : vector<8x1xf32> to vector<8x8xf32>
    %204 = arith.subf %203, %201 : vector<8x8xf32>
    %205 = arith.mulf %204, %11 : vector<8x8xf32>
    %cst_73 = arith.constant 0.000000e+00 : f32
    %206 = vector.broadcast %cst_73 : f32 to vector<8x8xf32>
    %207 = arith.maximumf %205, %206 : vector<8x8xf32>
    %208 = math.sqrt %207 : vector<8x8xf32>
    %209 = vector.broadcast %175 : f32 to vector<8x8xf32>
    %210 = arith.mulf %208, %209 : vector<8x8xf32>
    %211 = math.exp %210 : vector<8x8xf32>
    %cst_74 = arith.constant 9.99999974E-6 : f32
    %cst_75 = arith.constant 1.000000e+05 : f32
    %212 = vector.broadcast %cst_74 : f32 to vector<8x8xf32>
    %213 = arith.maximumf %212, %211 : vector<8x8xf32>
    %214 = vector.broadcast %cst_75 : f32 to vector<8x8xf32>
    %215 = arith.minimumf %214, %213 : vector<8x8xf32>
    %216 = arith.mulf %178, %215 : vector<8x8xf32>
    %cst_76 = arith.constant dense<0xFF800000> : vector<8xf32>
    %217 = vector.multi_reduction <maximumf>, %216, %cst_76 [1] : vector<8x8xf32> to vector<8xf32>
    %218 = vector.shape_cast %217 : vector<8xf32> to vector<8x1xf32>
    %219 = vector.broadcast %218 : vector<8x1xf32> to vector<8x8xf32>
    %220 = arith.subf %216, %219 : vector<8x8xf32>
    %221 = math.exp %220 : vector<8x8xf32>
    %cst_77 = arith.constant dense<0.000000e+00> : vector<8xf32>
    %222 = vector.multi_reduction <add>, %221, %cst_77 [1] : vector<8x8xf32> to vector<8xf32>
    %223 = vector.shape_cast %222 : vector<8xf32> to vector<8x1xf32>
    %224 = tpu.reciprocal %223 {approx = true} : vector<8x1xf32> -> vector<8x1xf32>
    %225 = arith.mulf %223, %224 : vector<8x1xf32>
    %cst_78 = arith.constant 2.000000e+00 : f32
    %226 = vector.broadcast %cst_78 : f32 to vector<8x1xf32>
    %227 = arith.subf %226, %225 : vector<8x1xf32>
    %228 = arith.mulf %224, %227 : vector<8x1xf32>
    %229 = arith.mulf %223, %228 : vector<8x1xf32>
    %cst_79 = arith.constant 2.000000e+00 : f32
    %230 = vector.broadcast %cst_79 : f32 to vector<8x1xf32>
    %231 = arith.subf %230, %229 : vector<8x1xf32>
    %232 = arith.mulf %228, %231 : vector<8x1xf32>
    %233 = vector.broadcast %232 : vector<8x1xf32> to vector<8x8xf32>
    %234 = arith.mulf %221, %233 : vector<8x8xf32>
    %cst_80 = arith.constant 0.000000e+00 : f32
    %235 = vector.broadcast %cst_80 : f32 to vector<8x8xf32>
    %236 = arith.select %19, %235, %234 : vector<8x8xi1>, vector<8x8xf32>
    %237 = arith.truncf %236 : vector<8x8xf32> to vector<8x8xbf16>
    %cst_81 = arith.constant dense<0.000000e+00> : vector<8x8xf32>
    %238 = tpu.matmul %237, %171, %cst_81 {dimension_numbers = #tpu.dot_dimension_numbers<[1], [0], [0], [1], [0, 0, 1, 1], [], []>} : vector<8x8xbf16>, vector<8x8xbf16>, vector<8x8xf32> -> vector<8x8xf32>
    %c0_82 = arith.constant 0 : index
    %c0_83 = arith.constant 0 : index
    %c24 = arith.constant 24 : index
    %239 = vector.load %arg4[%c0_82, %c0_83, %c24] : memref<1x8x32xbf16, #tpu.memory_space<vmem>>, vector<1x8x8xbf16>
    %240 = vector.shape_cast %239 : vector<1x8x8xbf16> to vector<8x8xbf16>
    %c0_84 = arith.constant 0 : index
    %c0_85 = arith.constant 0 : index
    %c24_86 = arith.constant 24 : index
    %241 = vector.load %arg5[%c0_84, %c0_85, %c24_86] : memref<1x8x32xbf16, #tpu.memory_space<vmem>>, vector<1x8x8xbf16>
    %242 = vector.shape_cast %241 : vector<1x8x8xbf16> to vector<8x8xbf16>
    %c0_87 = arith.constant 0 : index
    %c0_88 = arith.constant 0 : index
    %c24_89 = arith.constant 24 : index
    %243 = vector.load %arg6[%c0_87, %c0_88, %c24_89] : memref<1x8x32xbf16, #tpu.memory_space<vmem>>, vector<1x8x8xbf16>
    %244 = vector.shape_cast %243 : vector<1x8x8xbf16> to vector<8x8xbf16>
    %c4_i32_90 = arith.constant 4 : i32
    %245 = arith.muli %arg1, %c4_i32_90 : i32
    %c3_i32 = arith.constant 3 : i32
    %246 = arith.addi %245, %c3_i32 : i32
    %247 = arith.index_cast %246 : i32 to index
    %248 = memref.load %arg3[%247] : memref<4xf32, #tpu.memory_space<smem>>
    %cst_91 = arith.constant dense<0.000000e+00> : vector<8x8xf32>
    %249 = tpu.matmul %240, %242, %cst_91 {dimension_numbers = #tpu.dot_dimension_numbers<[1], [1], [0], [0], [0, 0, 1, 0], [], []>} : vector<8x8xbf16>, vector<8x8xbf16>, vector<8x8xf32> -> vector<8x8xf32>
    %cst_92 = arith.constant 0.353553385 : f32
    %250 = vector.broadcast %cst_92 : f32 to vector<8x8xf32>
    %251 = arith.mulf %249, %250 : vector<8x8xf32>
    %cst_93 = arith.constant -1.000000e+32 : f32
    %252 = vector.broadcast %cst_93 : f32 to vector<8x8xf32>
    %253 = arith.select %3, %252, %251 : vector<8x8xi1>, vector<8x8xf32>
    %cst_94 = arith.constant dense<0xFF800000> : vector<8xf32>
    %254 = vector.multi_reduction <maximumf>, %253, %cst_94 [1] : vector<8x8xf32> to vector<8xf32>
    %255 = vector.shape_cast %254 : vector<8xf32> to vector<8x1xf32>
    %256 = vector.broadcast %255 : vector<8x1xf32> to vector<8x8xf32>
    %257 = arith.subf %253, %256 : vector<8x8xf32>
    %258 = math.exp %257 : vector<8x8xf32>
    %cst_95 = arith.constant dense<0.000000e+00> : vector<8xf32>
    %259 = vector.multi_reduction <add>, %258, %cst_95 [1] : vector<8x8xf32> to vector<8xf32>
    %260 = vector.shape_cast %259 : vector<8xf32> to vector<8x1xf32>
    %261 = tpu.reciprocal %260 {approx = true} : vector<8x1xf32> -> vector<8x1xf32>
    %262 = arith.mulf %260, %261 : vector<8x1xf32>
    %cst_96 = arith.constant 2.000000e+00 : f32
    %263 = vector.broadcast %cst_96 : f32 to vector<8x1xf32>
    %264 = arith.subf %263, %262 : vector<8x1xf32>
    %265 = arith.mulf %261, %264 : vector<8x1xf32>
    %266 = arith.mulf %260, %265 : vector<8x1xf32>
    %cst_97 = arith.constant 2.000000e+00 : f32
    %267 = vector.broadcast %cst_97 : f32 to vector<8x1xf32>
    %268 = arith.subf %267, %266 : vector<8x1xf32>
    %269 = arith.mulf %265, %268 : vector<8x1xf32>
    %270 = vector.broadcast %269 : vector<8x1xf32> to vector<8x8xf32>
    %271 = arith.mulf %258, %270 : vector<8x8xf32>
    %272 = arith.mulf %271, %1 : vector<8x8xf32>
    %273 = arith.truncf %272 : vector<8x8xf32> to vector<8x8xbf16>
    %cst_98 = arith.constant dense<0.000000e+00> : vector<8x8xf32>
    %274 = tpu.matmul %273, %17, %cst_98 {dimension_numbers = #tpu.dot_dimension_numbers<[1], [0], [0], [1], [0, 0, 1, 1], [], []>} : vector<8x8xbf16>, vector<8x8xbf16>, vector<8x8xf32> -> vector<8x8xf32>
    %275 = vector.extract_strided_slice %274 {offsets = [0, 7], sizes = [8, 1], strides = [1, 1]} : vector<8x8xf32> to vector<8x1xf32>
    %276 = vector.broadcast %275 : vector<8x1xf32> to vector<8x8xf32>
    %277 = arith.subf %276, %274 : vector<8x8xf32>
    %278 = arith.mulf %277, %11 : vector<8x8xf32>
    %cst_99 = arith.constant 0.000000e+00 : f32
    %279 = vector.broadcast %cst_99 : f32 to vector<8x8xf32>
    %280 = arith.maximumf %278, %279 : vector<8x8xf32>
    %281 = math.sqrt %280 : vector<8x8xf32>
    %282 = vector.broadcast %248 : f32 to vector<8x8xf32>
    %283 = arith.mulf %281, %282 : vector<8x8xf32>
    %284 = math.exp %283 : vector<8x8xf32>
    %cst_100 = arith.constant 9.99999974E-6 : f32
    %cst_101 = arith.constant 1.000000e+05 : f32
    %285 = vector.broadcast %cst_100 : f32 to vector<8x8xf32>
    %286 = arith.maximumf %285, %284 : vector<8x8xf32>
    %287 = vector.broadcast %cst_101 : f32 to vector<8x8xf32>
    %288 = arith.minimumf %287, %286 : vector<8x8xf32>
    %289 = arith.mulf %251, %288 : vector<8x8xf32>
    %cst_102 = arith.constant dense<0xFF800000> : vector<8xf32>
    %290 = vector.multi_reduction <maximumf>, %289, %cst_102 [1] : vector<8x8xf32> to vector<8xf32>
    %291 = vector.shape_cast %290 : vector<8xf32> to vector<8x1xf32>
    %292 = vector.broadcast %291 : vector<8x1xf32> to vector<8x8xf32>
    %293 = arith.subf %289, %292 : vector<8x8xf32>
    %294 = math.exp %293 : vector<8x8xf32>
    %cst_103 = arith.constant dense<0.000000e+00> : vector<8xf32>
    %295 = vector.multi_reduction <add>, %294, %cst_103 [1] : vector<8x8xf32> to vector<8xf32>
    %296 = vector.shape_cast %295 : vector<8xf32> to vector<8x1xf32>
    %297 = tpu.reciprocal %296 {approx = true} : vector<8x1xf32> -> vector<8x1xf32>
    %298 = arith.mulf %296, %297 : vector<8x1xf32>
    %cst_104 = arith.constant 2.000000e+00 : f32
    %299 = vector.broadcast %cst_104 : f32 to vector<8x1xf32>
    %300 = arith.subf %299, %298 : vector<8x1xf32>
    %301 = arith.mulf %297, %300 : vector<8x1xf32>
    %302 = arith.mulf %296, %301 : vector<8x1xf32>
    %cst_105 = arith.constant 2.000000e+00 : f32
    %303 = vector.broadcast %cst_105 : f32 to vector<8x1xf32>
    %304 = arith.subf %303, %302 : vector<8x1xf32>
    %305 = arith.mulf %301, %304 : vector<8x1xf32>
    %306 = vector.broadcast %305 : vector<8x1xf32> to vector<8x8xf32>
    %307 = arith.mulf %294, %306 : vector<8x8xf32>
    %cst_106 = arith.constant 0.000000e+00 : f32
    %308 = vector.broadcast %cst_106 : f32 to vector<8x8xf32>
    %309 = arith.select %19, %308, %307 : vector<8x8xi1>, vector<8x8xf32>
    %310 = arith.truncf %309 : vector<8x8xf32> to vector<8x8xbf16>
    %cst_107 = arith.constant dense<0.000000e+00> : vector<8x8xf32>
    %311 = tpu.matmul %310, %244, %cst_107 {dimension_numbers = #tpu.dot_dimension_numbers<[1], [0], [0], [1], [0, 0, 1, 1], [], []>} : vector<8x8xbf16>, vector<8x8xbf16>, vector<8x8xf32> -> vector<8x8xf32>
    %312 = tpu.concatenate %92, %165, %238, %311 in 1 : vector<8x8xf32>, vector<8x8xf32>, vector<8x8xf32>, vector<8x8xf32> -> vector<8x32xf32>
    %c0_108 = arith.constant 0 : index
    %c0_109 = arith.constant 0 : index
    %c0_110 = arith.constant 0 : index
    %313 = vector.load %arg8[%c0_108, %c0_109, %c0_110] : memref<1x8x32xf32, #tpu.memory_space<vmem>>, vector<1x8x32xf32>
    %314 = vector.shape_cast %313 : vector<1x8x32xf32> to vector<8x32xf32>
    %315 = vector.shape_cast %312 : vector<8x32xf32> to vector<1x8x32xf32>
    tpu.vector_store %arg8[%c0_108, %c0_109, %c0_110], %315 {strides = array<i32>} : memref<1x8x32xf32, #tpu.memory_space<vmem>>, vector<1x8x32xf32>,
    return
  }
  func.func @transform_0(%arg0: i32, %arg1: i32, %arg2: i32) -> i32 {
    %c0_i32 = arith.constant 0 : i32
    %c0_i32_0 = arith.constant 0 : i32
    return %c0_i32 : i32
  }
  func.func @transform_1(%arg0: i32, %arg1: i32, %arg2: i32) -> (i32, i32, i32) {
    %c0_i32 = arith.constant 0 : i32
    return %arg0, %arg2, %arg1 : i32, i32, i32
  }
  func.func @transform_2(%arg0: i32, %arg1: i32, %arg2: i32) -> (i32, i32, i32) {
    %c0_i32 = arith.constant 0 : i32
    %c0_i32_0 = arith.constant 0 : i32
    return %arg0, %c0_i32, %arg1 : i32, i32, i32
  }
  func.func @transform_3(%arg0: i32, %arg1: i32, %arg2: i32) -> (i32, i32, i32) {
    %c0_i32 = arith.constant 0 : i32
    %c0_i32_0 = arith.constant 0 : i32
    return %arg0, %c0_i32, %arg1 : i32, i32, i32
  }
  func.func @transform_4(%arg0: i32, %arg1: i32, %arg2: i32) -> (i32, i32, i32, i32) {
    %c0_i32 = arith.constant 0 : i32
    %c0_i32_0 = arith.constant 0 : i32
    %c0_i32_1 = arith.constant 0 : i32
    %c0_i32_2 = arith.constant 0 : i32
    return %c0_i32, %c0_i32_0, %arg2, %c0_i32_1 : i32, i32, i32, i32
  }
  func.func @transform_5(%arg0: i32, %arg1: i32, %arg2: i32) -> (i32, i32, i32) {
    %c0_i32 = arith.constant 0 : i32
    return %arg0, %arg2, %arg1 : i32, i32, i32
  }
}

</mosaic_0001>

<bundles_post_ra>
// kernel: tpu_custom_call.1
= control target key start
LH: loop header
LB: loop body
LE: loop exit
PB: predicated region body
PF: predicated region fallthrough
CT: control target
= control target key end

     0   :  { %s1906_s0 = inlined_call_operand.hbm [shape: f32[4], index: 0, kind: input, shape index: {}]   ;;  %s1907_s1 = inlined_call_operand.hbm [shape: bf16[2,8,32], index: 1, kind: input, shape index: {}]   ;;  %s1908_s2 = inlined_call_operand.hbm [shape: bf16[2,8,32], index: 2, kind: input, shape index: {}]   ;;  %s1909_s3 = inlined_call_operand.hbm [shape: bf16[2,8,32], index: 3, kind: input, shape index: {}]   ;;  %s1910_s4 = inlined_call_operand.hbm [shape: f32[1,1,8,8], index: 4, kind: input, shape index: {}]   ;;  %s1911_s5 = inlined_call_operand.hbm [shape: f32[2,8,32], index: 5, kind: output, shape index: {}]  }
   0x1   :  { %1917 = sst [smem:[#allocation22_spill]] %s1906_s0 }
   0x2   :  { %1918 = sst [smem:[#allocation23_spill]] %s1907_s1 }
   0x3   :  { %1919 = sst [smem:[#allocation24_spill]] %s1908_s2 }
   0x4   :  { %1920 = sst [smem:[#allocation25_spill]] %s1910_s4 }
   0x5   :  { %10 = vsyncpa [#allocation5], 0 }
   0x6   :  { %11 = vsyncpa [#allocation3], 0 }
   0x7   :  { %13 = vsyncpa [#allocation3 + $0x1], 0 }
   0x8   :  { %14 = vsyncpa [#allocation8], 0 }
   0x9   :  { %16 = vsyncpa [#allocation8 + $0x1], 0 }
   0xa   :  { %17 = vsyncpa [#allocation11], 0 }
   0xb   :  { %18 = vsyncpa [#allocation4], 0 }
   0xc   :  { %20 = vsyncpa [#allocation4 + $0x1], 0  ;;  %s1587_s18 = smov 0   ;;  %s1589_s19 = smov 0  }
   0xd   :  { %s1591_s20 = smov 0   ;;  %s1593_s21 = smov 0  }
   0xe   :  { %s1595_s22 = smov 0   ;;  %s1597_s23 = smov 0  }
   0xf LB: > { %1921 = sst [smem:[#allocation18_spill]] %s1541_s22  ;;  %s45_s24 = sadd.s32 1, %s1541_s22  ;;  %s1545_s23 = sphi %s1597_s23, %s26_s23   ;;  %s1541_s22 = sphi %s1595_s22, %s1938_s22   ;;  %s1537_s21 = sphi %s1593_s21, %s1937_s21   ;;  %s1533_s20 = sphi %s1591_s20, %s1941_s20   ;;  %s1529_s19 = sphi %s1589_s19, %s1940_s19   ;;  %s1525_s18 = sphi %s1587_s18, %s1939_s18  }
  0x10   : > { %1922 = sst [smem:[#allocation19_spill]] %s1545_s23  ;;  %s77_s25 = sadd.s32 1, %s1533_s20 }
  0x11   : > { %p47_p0 = scmp.ge.s32.totalorder %s45_s24, 2  ;;  %p84_p1 = scmp.ne.s32.totalorder %s1533_s20, %s1529_s19 }
  0x12   : > { %p85_p2 = scmp.eq.s32.totalorder %s1545_s23, 0  ;;  %p1131_p3 = scmp.ge.s32.totalorder %s1545_s23, 2 }
  0x13   : > { %s1943_s24 = smov (%p47_p0, %s45_s24), 0  ;;  %p1204_p5 = scmp.lt.s32.totalorder %s1545_s23, 2 }
  0x14   : > { %1923 = sst [smem:[#allocation20_spill]] %s1943_s24  ;;  %p86_p4 = por %p85_p2, %p84_p1 }
  0x15   : > { %s70_s26 = ssub.s32 %s1541_s22, %s1943_s24  ;;  %s1912_s27 = sand.u32 1, %s1533_s20  }
  0x16   : > { %p75_p6 = scmp.eq.s32.totalorder %s70_s26, 0  ;;  %s1634_s28 = sshll.u32 %s1912_s27, 2 }
  0x17   : > { %s1637_s29 = sshll.u32 %s1541_s22, 2  ;;  %p1639_p7 = pnand %p1204_p5, %p86_p4 }
  0x18   : > { %s1644_s6 = scalar_select %p75_p6, %s1533_s20, %s77_s25  }
  0x19   : > { %s271_s7 = sand.u32 1, %s1545_s23   ;;  %s1926_s2 = sld [smem:[#allocation24_spill]] }
  0x1a   : > { %1925 = sst [smem:[#allocation21_spill]] %s1644_s6  ;;  %s275_s11 = scalar_lea.vmem [#allocation7], %s1634_s28 }
  0x1b   : > { %s284_s12 = sshll.u32 %s275_s11, 4  ;;  %s1652_s14 = scalar_lea.sflag [#allocation8], %s271_s7  ;;  %s285_s12 = int_to_ptr.vmem [resolvable:$true] %s284_s12 }
  0x1c   : > { %s1658_s15 = sadd.s32 4294967295, %s1545_s23   ;;  %s1127_s16 = sadd.s32 4294967294, %s1545_s23  }
  0x1d   : > { %p90_p8 = scmp.ne.s32.totalorder %s1529_s19, %s1525_s18  ;;  %p91_p9 = scmp.eq.s32.totalorder %s1658_s15, 0 }
  0x1e   : > { %p200_p10 = scmp.eq.s32.totalorder %s1658_s15, 1  ;;  %p206_p11 = scmp.eq.s32.totalorder %s1127_s16, 1 }
  0x1f   : > { %s280_s10 = scalar_lea.hbm %s1926_s2, %s1637_s29  ;;  %p1128_p12 = scmp.ge.s32.totalorder %s1545_s23, 1 }
  0x20   : > { %s282_s13 = sshll.u32 %s280_s10, 4  ;;  %p1668_p13 = por %p91_p9, %p90_p8  ;;  %s283_s13 = int_to_ptr.hbm [resolvable:$true] %s282_s13 }
  0x21   : > { %1194 = dma.hbm_to_vmem [thread:$0]  (!%p1639_p7), %s283_s13, 64, %s285_s12, %s1652_s14  }
  0x22   : > { %p1675_p0 = por %p200_p10, %p84_p1  ;;  %p1679_p2 = por %p206_p11, %p90_p8 }
  0x23   : > { %p213_p4 = scmp.lt.s32.totalorder %s1545_s23, 3  ;;  %s1930_s0 = sld [smem:[#allocation22_spill]] }
  0x24   : > { %s1932_s4 = sld [smem:[#allocation25_spill]]  ;;  %s1547_s16 = smov [#allocation10]  }
  0x25   : > { %p1687_p5 = pnand %p1128_p12, %p213_p4  ;;  %s239_s7 = sshll.u32 %s1547_s16, 4  ;;  %s240_s7 = int_to_ptr.vmem [resolvable:$true] %s239_s7 }
  0x26   : > { %s1933_s1 = sld [smem:[#allocation23_spill]]  ;;  %s1548_s2 = smov [#allocation2]  }
  0x27   : > { %p1181_p1 = pneg %p1687_p5  ;;  %s254_s12 = scalar_lea.vmem [#allocation6], %s1634_s28 }
  0x28   : > { %s1934_s24 = sand.u32 1, %s1533_s20   ;;  %s300_s23 = scalar_lea.hbm %s1909_s3, %s1637_s29 }
  0x29   : > { %s225_s9 = sshll.u32 %s1930_s0, 4  ;;  %p1182_p6 = pnand %p1181_p1, %p91_p9  ;;  %s226_s9 = int_to_ptr.hbm [resolvable:$true] %s225_s9 }
  0x2a   : > { %s237_s13 = sshll.u32 %s1932_s4, 4  ;;  %s264_s4 = sshll.u32 %s254_s12, 4  ;;  %s238_s13 = int_to_ptr.hbm [resolvable:$true] %s237_s13  ;;  %s265_s4 = int_to_ptr.vmem [resolvable:$true] %s264_s4 }
  0x2b   : > { %1184 = dma.hbm_to_smem (!%p1182_p6), %s226_s9, 16, %s1548_s2, [#allocation5]  }
  0x2c   : > { %s260_s0 = scalar_lea.hbm %s1933_s1, %s1637_s29  ;;  %s251_s22 = scalar_lea.sflag [#allocation3], %s1934_s24 }
  0x2d   : > { %1187 = dma.hbm_to_vmem [thread:$0]  (!%p1182_p6), %s238_s13, 128, %s240_s7, [#allocation11]  }
  0x2e   : > { %s262_s11 = sshll.u32 %s260_s0, 4  ;;  %s302_s27 = sshll.u32 %s300_s23, 4  ;;  %s263_s11 = int_to_ptr.hbm [resolvable:$true] %s262_s11  ;;  %s303_s27 = int_to_ptr.hbm [resolvable:$true] %s302_s27 }
  0x2f   : > { %1191 = dma.hbm_to_vmem [thread:$0]  (!%p1639_p7), %s263_s11, 64, %s265_s4, %s251_s22  }
  0x30   : > { %s295_s8 = scalar_lea.vmem [#allocation9], %s1634_s28  ;;  %313 = sbr.rel (%p1687_p5) target bundleno = 2378 (0x94a), region = 40 }
  0x31   : > { %s304_s1 = sshll.u32 %s295_s8, 4  ;;  %s305_s1 = int_to_ptr.vmem [resolvable:$true] %s304_s1 }
  0x32   : > { %1197 = dma.hbm_to_vmem [thread:$0]  (!%p1639_p7), %s303_s27, 64, %s305_s1, %s1652_s14  }
  0x35   : > { %1504 = dma.done.wait (%p91_p9), [#allocation5], 16  }
  0x36   : > { %1506 = vsyncadd (%p91_p9), [#allocation5], 4294967280  ;;  %s1722_s0 = sand.u32 1, %s1529_s19  }
  0x37   : > { %s1725_s2 = sshll.u32 %s1722_s0, 2  ;;  %s321_s4 = scalar_lea.sflag [#allocation3], %s1722_s0 }
  0x38   : > { %s324_s1 = scalar_lea.vmem [#allocation6], %s1725_s2 }
  0x39   : > { %1508 = dma.done.wait (%p1668_p13), %s321_s4, 64  }
  0x3a   : > { %1510 = vsyncadd (%p1668_p13), %s321_s4, 4294967232  ;;  %s330_s22 = sand.u32 1, %s1658_s15   ;;  %s334_s24 = scalar_lea.vmem [#allocation7], %s1725_s2 }
  0x3b   : > { %s331_s23 = scalar_lea.sflag [#allocation8], %s330_s22 }
  0x3c   : > { %1512 = dma.done.wait (%p1668_p13), %s331_s23, 128  }
  0x3d   : > { %1514 = vsyncadd (%p1668_p13), %s331_s23, 4294967168  ;;  %s344_s28 = scalar_lea.vmem [#allocation9], %s1725_s2 }
  0x3e   : > { %1516 = dma.done.wait (%p91_p9), [#allocation11], 128  }
  0x3f   : > { %1518 = vsyncadd (%p91_p9), [#allocation11], 4294967168 }
  0x40   : > { %355 = sfence }
  0x41   : > { %v409_v0 = vld [vmem:[%s334_s24] sm:$0xf]  ;;  %vm413_vm0 = vcmask 64512   ;;  %v408_v3 = vld [vmem:[%s324_s1] sm:$0xf]  ;;  %s1549_s29 = smov 120   ;;  %v391_v26 = vlaneseq }
  0x42   : > { %v418_v1 = vsel %vm413_vm0, %v409_v0, 0  ;;  %v547_v2 = vunpack.c.l.b16 %v409_v0  ;;  %v542_v5 = vunpack.c.l.b16 %v408_v3  ;;  %v1756_v10 = vld [vmem:[#allocation10] sm:$0xff]  ;;  %v1550_v29 = vmov 0.0   ;;  %s412_s30 = sld [smem:[#allocation2]]  ;;  %s1552_s14 = smov 104  }
  0x43   : > { %427 = vmatpush.bf16.xpose.msra.mxu0 %v418_v1  ;;  %vm390_vm1 = vcmp.eq.f32.partialorder %v1756_v10, 0.0  ;;  %v1772_v27 = vshrl.u32 %v391_v26, 7  ;;  %v394_v28 = vand.u32 127, %v391_v26  ;;  %vm457_vm3 = vcmask 1043456   ;;  %s1149_s6 = sld [smem:[#allocation2 + $0x1]]  ;;  %s1553_s15 = smov 112  }
  0x44   : > { %v1745_v4 = vpack.c.b16 %v547_v2, %v547_v2  ;;  %v1750_v6 = vpack.c.b16 %v542_v5, %v542_v5  ;;  %v1551_v49 = vmov 7   ;;  %s1554_s17 = smov 8   ;;  %s1153_s9 = sld [smem:[#allocation2 + $0x2]]  ;;  %vm948_vm14 = vcmask 130048  }
  0x45   : > { %vm403_vm2 = vcmp.le.s32.totalorder %v1772_v27, %v394_v28  ;;  %1266 = vset.pattern.permute.xlu0 %v1551_v49  ;;  %1267 = vset.pattern.permute.xlu1 %v1551_v49  ;;  %v398_v63 = vsub.s32 %v394_v28, %v1772_v27  ;;  %vm407_vm9 = vcmp.eq.s32.totalorder %v1772_v27, 0  ;;  %s1157_s10 = sld [smem:[#allocation2 + $0x3]]  ;;  %s1555_s13 = smov 16   ;;  %vm950_vm15 = vcmask 195584  }
  0x46   : > { %549 = vrot.lane.b32.xlu0 %v1745_v4, %s1549_s29  ;;  %v1145_v30 = vsel %vm403_vm2, 1.0, %v1550_v29  ;;  %s1556_s7 = smov 24   ;;  %s1144_s11 = sshll.u32 %s1722_s0, 3 }
  0x47   : > { %v406_v31 = vpack.c.bf16 %v1145_v30, %v1145_v30  ;;  %v400_v0 = vsub.s32 0, %v398_v63  ;;  %vm399_vm4 = vcmp.lt.s32.totalorder %v398_v63, 0  ;;  %s1162_s12 = sshll.u32 %s1537_s21, 3  ;;  %s387_s2 = scalar_lea.vmem [#allocation12], %s1144_s11 }
  0x48   : > { %s967_s8 = scalar_lea.hbm %s1911_s5, %s1162_s12  ;;  %s969_s4 = sshll.u32 %s387_s2, 4  ;;  %s970_s4 = int_to_ptr.vmem [resolvable:$true] %s969_s4 }
  0x49   : > { %v1776_v32 = vsel %vm457_vm3, %v406_v31, 0  ;;  %v401_v1 = vsel %vm399_vm4, %v400_v0, %v398_v63  ;;  %s971_s1 = sshll.u32 %s967_s8, 4  ;;  %s955_s21 = scalar_lea.sflag [#allocation4], %s1722_s0  ;;  %s972_s1 = int_to_ptr.hbm [resolvable:$true] %s971_s1 }
  0x4a   : > { %1146 = vmatmul.msk.bf16.vlgmr.msra.gmra.mxu0 %vm413_vm0, %v408_v3  ;;  %468 = vmatpush.bf16.msra.mxu1 %v1776_v32  ;;  %v1787_v2 = vcvt.s32.f32 %v401_v1  ;;  %s1465_s22 = sshra.s32 %s972_s1, 4  ;;  %s1466_s22 = int_to_ptr.hbm [resolvable:$true] %s1465_s22 }
  0x4b   : > { %s1467_s23 = scalar_lea.hbm %s1466_s22, 8  ;;  %p1472_p10 = scmp.lt.s32.totalorder %s1466_s22, %s1911_s5 }
  0x4c   : > { %p1468_p7 = scmp.ne.s32.totalorder %s1466_s22, %s1467_s23 }
  0x4e   : > { %544 = vrot.lane.b32.xlu0 %v1750_v6, %s1549_s29  ;;  %601 = vmatpush.bf16.msrb.mxu1 %v1776_v32  ;;  %p1469_p8 = pnand %p1468_p7, %p1675_p0 }
  0x50   : > { %p1470_p9 = pneg %p1469_p8 }
  0xb8   : > { %v550_v7 = vpop.permute.xlu0 %549 }
  0xb9   : > { %v555_v8 = vsel %vm413_vm0, %v550_v7, 0 }
  0xba   : > { %564 = vmatpush.bf16.xpose.msra.mxu3 %v555_v8 }
  0xc0   : > { %v545_v9 = vpop.permute.xlu0 %544 }
  0xc1   : > { %1150 = vmatmul.msk.bf16.vlgmr.msra.gmra.mxu3 %vm413_vm0, %v545_v9 }
  0xc2   : > { %733 = vmatpush.bf16.msrb.mxu3 %v1776_v32 }
  0xc7   : > { %v429_v11 = vpop.f32.mrf.mxu0 }
  0xc8   : > { %v1759_v12 = vmul.f32 0.35355338, %v429_v11 }
  0xca   : > { %v434_v13 = vsel %vm390_vm1, -1e+32, %v1759_v12 }
  0xcb   : > { %v435_v14 = vsel %vm413_vm0, %v434_v13, -inf }
  0xcc   : > { %436 = vmax.xlane.f32.xlu1 %v435_v14 }
  0xcf   : > { %v431_v15 = vpop.f32.mrf.mxu0 }
 0x13f   : > { %v437_v16 = vpop.xlane.xlu1 %436 }
 0x140   : > { %v438_v17 = vsub.f32 %v434_v13, %v437_v16 }
 0x142   : > { %v439_v18 = vmul.f32 1.442695, %v438_v17 }
 0x144   : > { %1268 = vpow2.f32 %v439_v18  ;;  %v566_v19 = vpop.f32.mrf.mxu3 }
 0x145   : > { %v1765_v20 = vmul.f32 0.35355338, %v566_v19 }
 0x147   : > { %v571_v21 = vsel %vm390_vm1, -1e+32, %v1765_v20 }
 0x148   : > { %v572_v22 = vsel %vm413_vm0, %v571_v21, -inf }
 0x149   : > { %573 = vmax.xlane.f32.xlu1 %v572_v22  ;;  %v494_v22 = vstv %s412_s30 }
 0x14a   : > { %v1269_v23 = vpop.eup %1268 }
 0x14b   : > { %v441_v24 = vsel %vm413_vm0, %v1269_v23, 0.0 }
 0x14c   : > { %v568_v25 = vpop.f32.mrf.mxu3  ;;  %442 = vadd.xlane.f32.xlu2 %v441_v24 }
 0x1bc   : > { %v574_v33 = vpop.xlane.xlu1 %573 }
 0x1bd   : > { %v575_v34 = vsub.f32 %v571_v21, %v574_v33 }
 0x1bf   : > { %v576_v35 = vmul.f32 1.442695, %v575_v34  ;;  %v443_v36 = vpop.xlane.xlu2 %442 }
 0x1c0   : > { %1270 = vrcp.f32 %v443_v36 }
 0x1c1   : > { %1272 = vpow2.f32 %v576_v35 }
 0x1c6   : > { %v1271_v37 = vpop.eup %1270 }
 0x1c7   : > { %v1273_v38 = vpop.eup %1272  ;;  %v445_v39 = vmul.f32 %v1271_v37, %v443_v36 }
 0x1c8   : > { %v578_v40 = vsel %vm413_vm0, %v1273_v38, 0.0 }
 0x1c9   : > { %v446_v41 = vsub.f32 2.0, %v445_v39  ;;  %579 = vadd.xlane.f32.xlu2 %v578_v40 }
 0x1cb   : > { %v447_v42 = vmul.f32 %v1271_v37, %v446_v41 }
 0x1cd   : > { %v448_v43 = vmul.f32 %v447_v42, %v443_v36 }
 0x1cf   : > { %v449_v44 = vsub.f32 2.0, %v448_v43 }
 0x1d1   : > { %v450_v45 = vmul.f32 %v449_v44, %v447_v42 }
 0x1d3   : > { %v451_v46 = vmul.f32 %v1269_v23, %v450_v45 }
 0x1d5   : > { %v452_v47 = vmul.f32 %v451_v46, %v1756_v10 }
 0x1d7   : > { %v453_v48 = vpack.c.bf16 %v452_v47, %v452_v47 }
 0x1d9   : > { %1147 = vmatmul.msk.bf16.vlgmr.msra.gmra.mxu1 %vm413_vm0, %v453_v48 }
 0x23c   : > { %v580_v50 = vpop.xlane.xlu2 %579 }
 0x23d   : > { %1274 = vrcp.f32 %v580_v50 }
 0x243   : > { %v1275_v51 = vpop.eup %1274 }
 0x244   : > { %v582_v52 = vmul.f32 %v1275_v51, %v580_v50 }
 0x246   : > { %v583_v53 = vsub.f32 2.0, %v582_v52 }
 0x248   : > { %v584_v54 = vmul.f32 %v1275_v51, %v583_v53 }
 0x24a   : > { %v585_v55 = vmul.f32 %v584_v54, %v580_v50 }
 0x24c   : > { %v586_v56 = vsub.f32 2.0, %v585_v55 }
 0x24e   : > { %v587_v57 = vmul.f32 %v586_v56, %v584_v54 }
 0x250   : > { %v588_v58 = vmul.f32 %v1273_v38, %v587_v57 }
 0x252   : > { %v589_v59 = vmul.f32 %v588_v58, %v1756_v10 }
 0x254   : > { %v590_v60 = vpack.c.bf16 %v589_v59, %v589_v59 }
 0x256   : > { %v470_v61 = vpop.f32.mrf.mxu1  ;;  %1151 = vmatmul.msk.bf16.vlgmr.msrb.gmra.mxu1 %vm413_vm0, %v590_v60 }
 0x257   : > { %476 = vperm.xlu0 %1266, %v470_v61  }
 0x25e   : > { %v472_v62 = vpop.f32.mrf.mxu1 }
 0x2c9   : > { %v477_v3 = vpop.permute.xlu0 %476 }
 0x2ca   : > { %v479_v5 = vsub.f32 %v477_v3, %v470_v61 }
 0x2cc   : > { %v480_v7 = vmul.f32 %v479_v5, %v1787_v2 }
 0x2ce   : > { %v481_v8 = vmax.f32 %v480_v7, 0.0 }
 0x2d0   : > { %1276 = vrsqrt.f32 %v481_v8  ;;  %vm489_vm5 = vcmp.eq.f32.partialorder %v481_v8, inf  ;;  %v492_v21 = vand.u32 2147483648, %v481_v8  ;;  %vm491_vm6 = vcmp.eq.f32.partialorder %v481_v8, 0.0 }
 0x2d3   : > { %v603_v9 = vpop.f32.mrf.mxu1 }
 0x2d4   : > { %609 = vperm.xlu1 %1267, %v603_v9  }
 0x2d6   : > { %v1277_v11 = vpop.eup %1276 }
 0x2d7   : > { %v483_v13 = vmul.f32 %v1277_v11, %v481_v8 }
 0x2d9   : > { %v484_v14 = vmul.f32 %v1277_v11, %v483_v13 }
 0x2db   : > { %v605_v15 = vpop.f32.mrf.mxu1  ;;  %v485_v16 = vmul.f32 0.5, %v484_v14 }
 0x2dc   : > { %810 = vrot.lane.b32.xlu1 %v1745_v4, %s1552_s14 }
 0x2dd   : > { %v486_v17 = vsub.f32 1.5, %v485_v16 }
 0x2df   : > { %v487_v18 = vmul.f32 %v1277_v11, %v486_v17 }
 0x2e1   : > { %v488_v19 = vmul.f32 %v487_v18, %v481_v8 }
 0x2e3   : > { %v490_v23 = vsel %vm489_vm5, %v481_v8, %v488_v19 }
 0x2e4   : > { %v493_v24 = vsel %vm491_vm6, %v492_v21, %v490_v23  ;;  %681 = vrot.lane.b32.xlu1 %v1745_v4, %s1553_s15 }
 0x2e5   : > { %v495_v25 = vmul.f32 %v494_v22, %v493_v24 }
 0x2e7   : > { %v496_v26 = vmul.f32 1.442695, %v495_v25 }
 0x2e9   : > { %1278 = vpow2.f32 %v496_v26 }
 0x2ec   : > { %808 = vrot.lane.b32.xlu1 %v1750_v6, %s1552_s14 }
 0x2ef   : > { %v1279_v28 = vpop.eup %1278 }
 0x2f0   : > { %v498_v29 = vmax.f32 %v1279_v28, 1e-05 }
 0x2f2   : > { %v499_v30 = vmin.f32 %v498_v29, 100000.0 }
 0x2f4   : > { %v500_v31 = vmul.f32 %v499_v30, %v1759_v12  ;;  %v627_v12 = vstv %s1149_s6 }
 0x2f6   : > { %v501_v33 = vsel %vm413_vm0, %v500_v31, -inf }
 0x2f7   : > { %502 = vmax.xlane.f32.xlu2 %v501_v33 }
 0x346   : > { %v610_v34 = vpop.permute.xlu1 %609 }
 0x347   : > { %v612_v35 = vsub.f32 %v610_v34, %v603_v9 }
 0x349   : > { %v613_v36 = vmul.f32 %v612_v35, %v1787_v2 }
 0x34b   : > { %v614_v37 = vmax.f32 %v613_v36, 0.0 }
 0x34d   : > { %1280 = vrsqrt.f32 %v614_v37  ;;  %vm622_vm7 = vcmp.eq.f32.partialorder %v614_v37, inf  ;;  %v625_v45 = vand.u32 2147483648, %v614_v37  ;;  %vm624_vm8 = vcmp.eq.f32.partialorder %v614_v37, 0.0 }
 0x34e   : > { %v811_v19 = vpop.permute.xlu1 %810 }
 0x34f   : > { %v816_v25 = vsel %vm413_vm0, %v811_v19, 0 }
 0x353   : > { %v1281_v38 = vpop.eup %1280 }
 0x354   : > { %v616_v39 = vmul.f32 %v1281_v38, %v614_v37 }
 0x356   : > { %v617_v40 = vmul.f32 %v1281_v38, %v616_v39  ;;  %v682_v21 = vpop.permute.xlu1 %681 }
 0x357   : > { %v687_v22 = vsel %vm413_vm0, %v682_v21, 0 }
 0x358   : > { %v618_v41 = vmul.f32 0.5, %v617_v40  ;;  %696 = vmatpush.bf16.xpose.msrb.mxu0 %v687_v22 }
 0x35a   : > { %v619_v42 = vsub.f32 1.5, %v618_v41 }
 0x35c   : > { %v620_v43 = vmul.f32 %v1281_v38, %v619_v42 }
 0x35e   : > { %v621_v44 = vmul.f32 %v620_v43, %v614_v37  ;;  %v809_v39 = vpop.permute.xlu1 %808 }
 0x360   : > { %v623_v46 = vsel %vm622_vm7, %v614_v37, %v621_v44  ;;  %862 = vmatpush.bf16.msra.mxu0 %v1776_v32 }
 0x361   : > { %v626_v47 = vsel %vm624_vm8, %v625_v45, %v623_v46 }
 0x362   : > { %v628_v48 = vmul.f32 %v627_v12, %v626_v47 }
 0x364   : > { %v629_v49 = vmul.f32 1.442695, %v628_v48 }
 0x366   : > { %1282 = vpow2.f32 %v629_v49 }
 0x36a   : > { %v503_v50 = vpop.xlane.xlu2 %502 }
 0x36b   : > { %v504_v51 = vsub.f32 %v500_v31, %v503_v50 }
 0x36c   : > { %v1283_v52 = vpop.eup %1282 }
 0x36d   : > { %v505_v53 = vmul.f32 1.442695, %v504_v51  ;;  %v631_v54 = vmax.f32 %v1283_v52, 1e-05 }
 0x36f   : > { %1284 = vpow2.f32 %v505_v53  ;;  %v632_v55 = vmin.f32 %v631_v54, 100000.0 }
 0x371   : > { %v633_v56 = vmul.f32 %v632_v55, %v1765_v20  ;;  %v410_v20 = vld [vmem:[%s344_s28] sm:$0xf] }
 0x372   : > { %v524_v60 = vsel %vm457_vm3, %v410_v20, 0  ;;  %v654_v17 = vunpack.c.l.b16 %v410_v20 }
 0x373   : > { %v634_v57 = vsel %vm413_vm0, %v633_v56, -inf  ;;  %533 = vmatpush.bf16.msra.mxu2 %v524_v60 }
 0x374   : > { %635 = vmax.xlane.f32.xlu2 %v634_v57  ;;  %v1810_v18 = vpack.c.b16 %v654_v17, %v654_v17 }
 0x375   : > { %v1285_v58 = vpop.eup %1284 }
 0x376   : > { %v507_v59 = vsel %vm413_vm0, %v1285_v58, 0.0 }
 0x377   : > { %508 = vadd.xlane.f32.xlu0 %v507_v59 }
 0x3e7   : > { %v636_v61 = vpop.xlane.xlu2 %635 }
 0x3e8   : > { %v637_v62 = vsub.f32 %v633_v56, %v636_v61 }
 0x3ea   : > { %v638_v63 = vmul.f32 1.442695, %v637_v62  ;;  %v509_v0 = vpop.xlane.xlu0 %508 }
 0x3eb   : > { %1286 = vrcp.f32 %v509_v0 }
 0x3ec   : > { %1288 = vpow2.f32 %v638_v63 }
 0x3f1   : > { %v1287_v1 = vpop.eup %1286 }
 0x3f2   : > { %v1289_v3 = vpop.eup %1288  ;;  %v511_v5 = vmul.f32 %v1287_v1, %v509_v0 }
 0x3f3   : > { %v640_v7 = vsel %vm413_vm0, %v1289_v3, 0.0 }
 0x3f4   : > { %v512_v4 = vsub.f32 2.0, %v511_v5  ;;  %641 = vadd.xlane.f32.xlu2 %v640_v7 }
 0x3f6   : > { %v513_v8 = vmul.f32 %v1287_v1, %v512_v4 }
 0x3f8   : > { %v514_v9 = vmul.f32 %v513_v8, %v509_v0 }
 0x3fa   : > { %v515_v11 = vsub.f32 2.0, %v514_v9 }
 0x3fc   : > { %v516_v13 = vmul.f32 %v515_v11, %v513_v8 }
 0x3fe   : > { %v517_v14 = vmul.f32 %v1285_v58, %v516_v13 }
 0x400   : > { %v518_v15 = vsel %vm407_vm9, 0.0, %v517_v14 }
 0x401   : > { %v519_v16 = vpack.c.bf16 %v518_v15, %v518_v15 }
 0x403   : > { %1148 = vmatmul.msk.bf16.vlgmr.msra.gmra.mxu2 %vm413_vm0, %v519_v16 }
 0x40c   : > { %656 = vrot.lane.b32.xlu2 %v1810_v18, %s1549_s29  ;;  %s1471_s29 = scalar_lea.hbm %s1911_s5, 16 }
 0x40d   : > { %p1473_p11 = scmp.lt.s32.totalorder %s1471_s29, %s1467_s23 }
 0x40f   : > { %p1474_p12 = por %p1473_p11, %p1472_p10 }
 0x411   : > { %p1475_p13 = pnand %p1474_p12, %p1470_p9 }
 0x414   : > { %679 = vrot.lane.b32.xlu2 %v1750_v6, %s1553_s15 }
 0x467   : > { %v642_v23 = vpop.xlane.xlu2 %641 }
 0x468   : > { %1290 = vrcp.f32 %v642_v23 }
 0x46e   : > { %v1291_v24 = vpop.eup %1290 }
 0x46f   : > { %v644_v26 = vmul.f32 %v1291_v24, %v642_v23  ;;  %v657_v28 = vpop.permute.xlu2 %656 }
 0x470   : > { %v662_v29 = vsel %vm457_vm3, %v657_v28, 0 }
 0x471   : > { %v645_v30 = vsub.f32 2.0, %v644_v26  ;;  %671 = vmatpush.bf16.msrb.mxu2 %v662_v29 }
 0x473   : > { %v646_v6 = vmul.f32 %v1291_v24, %v645_v30 }
 0x475   : > { %825 = vmatpush.bf16.xpose.msra.mxu2 %v816_v25  ;;  %v647_v31 = vmul.f32 %v646_v6, %v642_v23 }
 0x477   : > { %v648_v33 = vsub.f32 2.0, %v647_v31  ;;  %v680_v34 = vpop.permute.xlu2 %679 }
 0x478   : > { %1154 = vmatmul.msk.bf16.vlgmr.msrb.gmra.mxu0 %vm413_vm0, %v680_v34 }
 0x479   : > { %v649_v35 = vmul.f32 %v648_v33, %v646_v6 }
 0x47b   : > { %v650_v32 = vmul.f32 %v1289_v3, %v649_v35 }
 0x47d   : > { %v651_v36 = vsel %vm407_vm9, 0.0, %v650_v32 }
 0x47e   : > { %v652_v37 = vpack.c.bf16 %v651_v36, %v651_v36 }
 0x480   : > { %1152 = vmatmul.msk.bf16.vlgmr.msrb.gmra.mxu2 %vm413_vm0, %v652_v37 }
 0x486   : > { %v1824_v38 = vpop.f32.mrf.mxu2 }
 0x48e   : > { %v537_v40 = vpop.f32.mrf.mxu2 }
 0x490   : > { %1158 = vmatmul.msk.bf16.vlgmr.msra.gmra.mxu2 %vm413_vm0, %v809_v39 }
 0x4f5   : > { %v698_v41 = vpop.f32.mrf.mxu0 }
 0x4f6   : > { %v1827_v42 = vmul.f32 0.35355338, %v698_v41 }
 0x4f8   : > { %v703_v43 = vsel %vm390_vm1, -1e+32, %v1827_v42 }
 0x4f9   : > { %v704_v44 = vsel %vm413_vm0, %v703_v43, -inf }
 0x4fa   : > { %705 = vmax.xlane.f32.xlu1 %v704_v44 }
 0x4fd   : > { %v700_v45 = vpop.f32.mrf.mxu0 }
 0x503   : > { %v673_v12 = vpop.f32.mrf.mxu2 }
 0x50b   : > { %v675_v46 = vpop.f32.mrf.mxu2 }
 0x513   : > { %v827_v47 = vpop.f32.mrf.mxu2 }
 0x514   : > { %v1833_v48 = vmul.f32 0.35355338, %v827_v47 }
 0x516   : > { %v832_v49 = vsel %vm390_vm1, -1e+32, %v1833_v48  ;;  %vm952_vm1 = vcmask 261120  }
 0x517   : > { %v833_v50 = vsel %vm413_vm0, %v832_v49, -inf }
 0x518   : > { %834 = vmax.xlane.f32.xlu2 %v833_v50 }
 0x51b   : > { %v829_v51 = vpop.f32.mrf.mxu2 }
 0x56d   : > { %v706_v52 = vpop.xlane.xlu1 %705 }
 0x56e   : > { %v707_v53 = vsub.f32 %v703_v43, %v706_v52 }
 0x570   : > { %v708_v54 = vmul.f32 1.442695, %v707_v53 }
 0x572   : > { %1292 = vpow2.f32 %v708_v54 }
 0x578   : > { %v1293_v55 = vpop.eup %1292 }
 0x579   : > { %v710_v56 = vsel %vm413_vm0, %v1293_v55, 0.0 }
 0x57a   : > { %711 = vadd.xlane.f32.xlu0 %v710_v56 }
 0x58b   : > { %v835_v57 = vpop.xlane.xlu2 %834 }
 0x58c   : > { %v836_v58 = vsub.f32 %v832_v49, %v835_v57 }
 0x58e   : > { %v837_v59 = vmul.f32 1.442695, %v836_v58 }
 0x590   : > { %1294 = vpow2.f32 %v837_v59 }
 0x596   : > { %v1295_v20 = vpop.eup %1294 }
 0x597   : > { %v839_v60 = vsel %vm413_vm0, %v1295_v20, 0.0 }
 0x598   : > { %840 = vadd.xlane.f32.xlu0 %v839_v60 }
 0x5ed   : > { %v712_v61 = vpop.xlane.xlu0 %711 }
 0x5ee   : > { %1296 = vrcp.f32 %v712_v61 }
 0x5f4   : > { %v1297_v62 = vpop.eup %1296 }
 0x5f5   : > { %v714_v63 = vmul.f32 %v1297_v62, %v712_v61 }
 0x5f7   : > { %v715_v0 = vsub.f32 2.0, %v714_v63 }
 0x5f9   : > { %v716_v1 = vmul.f32 %v1297_v62, %v715_v0  ;;  %v888_v0 = vstv %s1157_s10 }
 0x5fb   : > { %v717_v3 = vmul.f32 %v716_v1, %v712_v61 }
 0x5fd   : > { %v718_v5 = vsub.f32 2.0, %v717_v3 }
 0x5ff   : > { %v719_v7 = vmul.f32 %v718_v5, %v716_v1 }
 0x601   : > { %v720_v4 = vmul.f32 %v1293_v55, %v719_v7 }
 0x603   : > { %v721_v8 = vmul.f32 %v720_v4, %v1756_v10 }
 0x605   : > { %v722_v9 = vpack.c.bf16 %v721_v8, %v721_v8 }
 0x607   : > { %1155 = vmatmul.msk.bf16.vlgmr.msrb.gmra.mxu3 %vm413_vm0, %v722_v9 }
 0x60b   : > { %v841_v11 = vpop.xlane.xlu0 %840 }
 0x60c   : > { %1298 = vrcp.f32 %v841_v11 }
 0x612   : > { %v1299_v13 = vpop.eup %1298 }
 0x613   : > { %v843_v14 = vmul.f32 %v1299_v13, %v841_v11 }
 0x615   : > { %v844_v15 = vsub.f32 2.0, %v843_v14 }
 0x617   : > { %v845_v16 = vmul.f32 %v1299_v13, %v844_v15 }
 0x619   : > { %v846_v17 = vmul.f32 %v845_v16, %v841_v11 }
 0x61b   : > { %v847_v19 = vsub.f32 2.0, %v846_v17 }
 0x61d   : > { %v848_v21 = vmul.f32 %v847_v19, %v845_v16 }
 0x61f   : > { %v849_v22 = vmul.f32 %v1295_v20, %v848_v21 }
 0x621   : > { %v850_v23 = vmul.f32 %v849_v22, %v1756_v10 }
 0x623   : > { %v851_v24 = vpack.c.bf16 %v850_v23, %v850_v23 }
 0x625   : > { %1159 = vmatmul.msk.bf16.vlgmr.msra.gmra.mxu0 %vm413_vm0, %v851_v24 }
 0x68a   : > { %v735_v25 = vpop.f32.mrf.mxu3 }
 0x68b   : > { %741 = vperm.xlu1 %1267, %v735_v25  }
 0x692   : > { %v737_v26 = vpop.f32.mrf.mxu3 }
 0x693   : > { %914 = vrot.lane.b32.xlu1 %v1810_v18, %s1552_s14 }
 0x69b   : > { %936 = vrot.lane.b32.xlu1 %v673_v12, %s1554_s17  ;;  %v759_v12 = vstv %s1153_s9 }
 0x6a2   : > { %v864_v28 = vpop.f32.mrf.mxu0 }
 0x6a3   : > { %870 = vperm.xlu0 %1266, %v864_v28  }
 0x6aa   : > { %v866_v29 = vpop.f32.mrf.mxu0 }
 0x6fd   : > { %v742_v30 = vpop.permute.xlu1 %741 }
 0x6fe   : > { %v744_v6 = vsub.f32 %v742_v30, %v735_v25 }
 0x700   : > { %v745_v31 = vmul.f32 %v744_v6, %v1787_v2 }
 0x702   : > { %v746_v33 = vmax.f32 %v745_v31, 0.0 }
 0x704   : > { %1300 = vrsqrt.f32 %v746_v33  ;;  %vm754_vm10 = vcmp.eq.f32.partialorder %v746_v33, inf  ;;  %v757_v45 = vand.u32 2147483648, %v746_v33  ;;  %vm756_vm11 = vcmp.eq.f32.partialorder %v746_v33, 0.0 }
 0x705   : > { %v915_v10 = vpop.permute.xlu1 %914 }
 0x706   : > { %v920_v34 = vsel %vm457_vm3, %v915_v10, 0 }
 0x707   : > { %929 = vmatpush.bf16.msra.mxu3 %v920_v34 }
 0x70a   : > { %v1301_v35 = vpop.eup %1300 }
 0x70b   : > { %v748_v32 = vmul.f32 %v1301_v35, %v746_v33 }
 0x70d   : > { %v749_v36 = vmul.f32 %v1301_v35, %v748_v32 }
 0x70f   : > { %v750_v37 = vmul.f32 0.5, %v749_v36 }
 0x711   : > { %v751_v39 = vsub.f32 1.5, %v750_v37 }
 0x713   : > { %v752_v40 = vmul.f32 %v1301_v35, %v751_v39 }
 0x715   : > { %v871_v41 = vpop.permute.xlu0 %870  ;;  %v753_v43 = vmul.f32 %v752_v40, %v746_v33 }
 0x716   : > { %v873_v44 = vsub.f32 %v871_v41, %v864_v28 }
 0x717   : > { %v755_v46 = vsel %vm754_vm10, %v746_v33, %v753_v43 }
 0x718   : > { %v874_v47 = vmul.f32 %v873_v44, %v1787_v2  ;;  %v758_v49 = vsel %vm756_vm11, %v757_v45, %v755_v46 }
 0x719   : > { %v760_v50 = vmul.f32 %v759_v12, %v758_v49 }
 0x71a   : > { %v875_v51 = vmax.f32 %v874_v47, 0.0 }
 0x71b   : > { %v761_v52 = vmul.f32 1.442695, %v760_v50 }
 0x71c   : > { %1302 = vrsqrt.f32 %v875_v51  ;;  %vm883_vm12 = vcmp.eq.f32.partialorder %v875_v51, inf  ;;  %v886_v63 = vand.u32 2147483648, %v875_v51  ;;  %vm885_vm13 = vcmp.eq.f32.partialorder %v875_v51, 0.0 }
 0x71d   : > { %1304 = vpow2.f32 %v761_v52  ;;  %v937_v52 = vpop.permute.xlu1 %936 }
 0x722   : > { %v1303_v53 = vpop.eup %1302 }
 0x723   : > { %v1305_v54 = vpop.eup %1304  ;;  %v877_v55 = vmul.f32 %v1303_v53, %v875_v51 }
 0x724   : > { %v763_v56 = vmax.f32 %v1305_v54, 1e-05 }
 0x725   : > { %v878_v57 = vmul.f32 %v1303_v53, %v877_v55 }
 0x726   : > { %v764_v58 = vmin.f32 %v763_v56, 100000.0 }
 0x727   : > { %v879_v59 = vmul.f32 0.5, %v878_v57 }
 0x728   : > { %v765_v20 = vmul.f32 %v764_v58, %v1827_v42 }
 0x729   : > { %v880_v60 = vsub.f32 1.5, %v879_v59 }
 0x72a   : > { %v766_v61 = vsel %vm413_vm0, %v765_v20, -inf }
 0x72b   : > { %767 = vmax.xlane.f32.xlu2 %v766_v61  ;;  %v881_v2 = vmul.f32 %v1303_v53, %v880_v60  ;;  %v947_v53 = vsel %vm413_vm0, %v1824_v38, %v937_v52 }
 0x72d   : > { %v882_v62 = vmul.f32 %v881_v2, %v875_v51 }
 0x72f   : > { %v884_v1 = vsel %vm883_vm12, %v875_v51, %v882_v62 }
 0x730   : > { %v887_v3 = vsel %vm885_vm13, %v886_v63, %v884_v1 }
 0x731   : > { %v889_v5 = vmul.f32 %v888_v0, %v887_v3 }
 0x733   : > { %v890_v7 = vmul.f32 1.442695, %v889_v5 }
 0x735   : > { %1306 = vpow2.f32 %v890_v7 }
 0x73b   : > { %v1307_v4 = vpop.eup %1306 }
 0x73c   : > { %v892_v8 = vmax.f32 %v1307_v4, 1e-05 }
 0x73e   : > { %v893_v9 = vmin.f32 %v892_v8, 100000.0 }
 0x740   : > { %v894_v42 = vmul.f32 %v893_v9, %v1833_v48 }
 0x742   : > { %v895_v11 = vsel %vm413_vm0, %v894_v42, -inf }
 0x743   : > { %896 = vmax.xlane.f32.xlu0 %v895_v11 }
 0x79e   : > { %v768_v13 = vpop.xlane.xlu2 %767 }
 0x79f   : > { %v769_v14 = vsub.f32 %v765_v20, %v768_v13 }
 0x7a1   : > { %v770_v15 = vmul.f32 1.442695, %v769_v14 }
 0x7a3   : > { %1308 = vpow2.f32 %v770_v15 }
 0x7a9   : > { %v1309_v16 = vpop.eup %1308 }
 0x7aa   : > { %v772_v17 = vsel %vm413_vm0, %v1309_v16, 0.0 }
 0x7ab   : > { %773 = vadd.xlane.f32.xlu2 %v772_v17 }
 0x7b6   : > { %v897_v19 = vpop.xlane.xlu0 %896 }
 0x7b7   : > { %v898_v21 = vsub.f32 %v894_v42, %v897_v19 }
 0x7b9   : > { %v899_v22 = vmul.f32 1.442695, %v898_v21 }
 0x7bb   : > { %1310 = vpow2.f32 %v899_v22 }
 0x7c1   : > { %v1311_v23 = vpop.eup %1310 }
 0x7c2   : > { %v901_v24 = vsel %vm413_vm0, %v1311_v23, 0.0 }
 0x7c3   : > { %902 = vadd.xlane.f32.xlu2 %v901_v24 }
 0x7db   : > { %785 = vrot.lane.b32.xlu2 %v1810_v18, %s1553_s15 }
 0x81e   : > { %v774_v48 = vpop.xlane.xlu2 %773 }
 0x81f   : > { %1312 = vrcp.f32 %v774_v48 }
 0x825   : > { %v1313_v25 = vpop.eup %1312 }
 0x826   : > { %v776_v26 = vmul.f32 %v1313_v25, %v774_v48 }
 0x828   : > { %v777_v28 = vsub.f32 2.0, %v776_v26 }
 0x82a   : > { %v778_v29 = vmul.f32 %v1313_v25, %v777_v28 }
 0x82c   : > { %v779_v30 = vmul.f32 %v778_v29, %v774_v48 }
 0x82e   : > { %v780_v6 = vsub.f32 2.0, %v779_v30 }
 0x830   : > { %v781_v31 = vmul.f32 %v780_v6, %v778_v29 }
 0x832   : > { %v782_v10 = vmul.f32 %v1309_v16, %v781_v31 }
 0x834   : > { %v783_v35 = vsel %vm407_vm9, 0.0, %v782_v10 }
 0x835   : > { %v784_v39 = vpack.c.bf16 %v783_v35, %v783_v35 }
 0x836   : > { %v903_v33 = vpop.xlane.xlu2 %902 }
 0x837   : > { %1314 = vrcp.f32 %v903_v33 }
 0x83d   : > { %v1315_v34 = vpop.eup %1314 }
 0x83e   : > { %v905_v32 = vmul.f32 %v1315_v34, %v903_v33  ;;  %v786_v36 = vpop.permute.xlu2 %785 }
 0x83f   : > { %v791_v18 = vsel %vm457_vm3, %v786_v36, 0 }
 0x840   : > { %v906_v37 = vsub.f32 2.0, %v905_v32  ;;  %800 = vmatpush.bf16.msra.mxu1 %v791_v18 }
 0x842   : > { %v907_v40 = vmul.f32 %v1315_v34, %v906_v37 }
 0x843   : > { %1156 = vmatmul.msk.bf16.vlgmr.msra.gmra.mxu1 %vm413_vm0, %v784_v39 }
 0x844   : > { %v908_v41 = vmul.f32 %v907_v40, %v903_v33 }
 0x846   : > { %v909_v43 = vsub.f32 2.0, %v908_v41 }
 0x848   : > { %v910_v44 = vmul.f32 %v909_v43, %v907_v40 }
 0x84a   : > { %v911_v45 = vmul.f32 %v1311_v23, %v910_v44 }
 0x84c   : > { %v912_v12 = vsel %vm407_vm9, 0.0, %v911_v45 }
 0x84d   : > { %v913_v46 = vpack.c.bf16 %v912_v12, %v912_v12 }
 0x84f   : > { %1160 = vmatmul.msk.bf16.vlgmr.msra.gmra.mxu3 %vm413_vm0, %v913_v46 }
 0x8c0   : > { %v802_v47 = vpop.f32.mrf.mxu1 }
 0x8c1   : > { %940 = vrot.lane.b32.xlu1 %v802_v47, %s1555_s13 }
 0x8c8   : > { %v804_v49 = vpop.f32.mrf.mxu1 }
 0x8d2   : > { %v931_v50 = vpop.f32.mrf.mxu3 }
 0x8d3   : > { %944 = vrot.lane.b32.xlu0 %v931_v50, %s1556_s7 }
 0x8da   : > { %v933_v51 = vpop.f32.mrf.mxu3 }
 0x933   : > { %v941_v27 = vpop.permute.xlu1 %940 }
 0x934   : > { %v949_v54 = vsel %vm948_vm14, %v947_v53, %v941_v27 }
 0x945   : > { %v945_v55 = vpop.permute.xlu0 %944 }
 0x946   : > { %v951_v56 = vsel %vm950_vm15, %v949_v54, %v945_v55 }
 0x947   : > { %953 = vst.msk [vmem:[%s387_s2] sm:$0xff] %vm952_vm1, %v951_v56 }
 0x948   : > { %1478 = shalt.err (!%p1475_p13)
}
 0x949   : > { %1179 = dma.vmem_to_hbm [thread:$0]  (%p1675_p0), %s970_s4, 128, %s972_s1, %s955_s21  }
 0x94a PF: > { %s1935_s0 = sld [smem:[#allocation19_spill]]  ;;  %s983_s14 = sand.u32 1, %s1525_s18  }
 0x94b   : > { %p1199_p4 = pnand %p1131_p3, %p1679_p2  ;;  %s984_s15 = scalar_lea.sflag [#allocation4], %s983_s14 }
 0x94d   : > { %p1200_p5 = pneg %p1199_p4 }
 0x94f   : > { %1520 = dma.done.wait (%p1200_p5), %s984_s15, 128  }
 0x950   : > { %1522 = vsyncadd (%p1200_p5), %s984_s15, 4294967168  ;;  %s26_s23 = sadd.s32 1, %s1935_s0   ;;  %s1936_s17 = sld [smem:[#allocation21_spill]] }
 0x951   : > { %p23_p1 = scmp.ge.s32.totalorder %s26_s23, 4   ;;  %s1937_s21 = sld [smem:[#allocation18_spill]] }
 0x952   : > { %s1938_s22 = sld [smem:[#allocation20_spill]]  ;;  %s1939_s18 = smov %s1529_s19 }
 0x953   : > { %s1940_s19 = smov %s1533_s20  ;;  %25 = sbr.rel (!%p23_p1) target bundleno = 15 (0xf), region = 119 }
 0x956   : > { %s1941_s20 = smov %s1936_s17 }
 0x958   :  { %990 = vsyncpa [#allocation3], 1 }
 0x959   :  { %992 = vsyncpa [#allocation3 + $0x1], 1 }
 0x95a   :  { %993 = vsyncpa [#allocation8], 1 }
 0x95b   :  { %995 = vsyncpa [#allocation8 + $0x1], 1 }
 0x95c   :  { %996 = vsyncpa [#allocation11], 1 }
 0x95d   :  { %997 = vsyncpa [#allocation4], 1 }
 0x95e   :  { %999 = vsyncpa [#allocation4 + $0x1], 1 }
 0x95f   :  { %1000 = vsyncpa [#allocation5], 1 }
 0x960   :  { %1002 = vsyncpa [#allocation5 + $0x1], 1 }

</bundles_post_ra>
